<compile_context>
chip_gen: v7x
topology: tpu7x:2x2x1
jax: 0.10.0
libtpu: 0.0.40
codegen_flags: <defaults>
</compile_context>

<pallas_src>
import functools
import math

import jax
import jax.numpy as jnp
from jax.experimental import pallas as pl
from jax.experimental.pallas import tpu as pltpu


def _make_single_conv_kernel(th, w_out, cin, cout, kpad):
    """3x3 conv as a single im2col MXU matmul + folded bias/BN + ReLU, one row band per step."""
    k9 = 9 * cin
    m = th * w_out

    def kernel(x_ref, w_ref, shift_ref, o_ref):
        # x_ref:     (1, Hpad+2, Wp, Cin)  bf16  zero-padded image (re-used across row tiles)
        # w_ref:     (kpad, 128)           bf16  im2col weights, BN scale folded in, zero-padded
        # shift_ref: (1, 128)              f32   conv-bias + BN shift, zero-padded
        # o_ref:     (1, Cout, th*w_out)   f32   output row band, channels-major (lane-dense)
        i = pl.program_id(1)
        row0 = i * th
        if th % 8 == 0:
            row0 = pl.multiple_of(row0, 8)

        # --- im2col patch assembled fully in registers (no VMEM scratch round-trip). ---
        taps = []
        for dy in range(3):
            rows = x_ref[0, pl.ds(row0 + dy, th), :, :]            # (th, Wp, cin) bf16
            for dx in range(3):
                taps.append(rows[:, dx:dx + w_out, :].reshape(m, cin))
        if kpad > k9:                                              # K-pad lanes (match weight rows)
            taps.append(jnp.zeros((m, kpad - k9), jnp.bfloat16))
        patch = jnp.concatenate(taps, axis=1)                      # (m, kpad) bf16

        acc = jnp.dot(patch, w_ref[...],
                      preferred_element_type=jnp.float32)          # (m, 128) f32

        # bias + eval-mode BN shift (scale already in the weights), then ReLU.
        y = jnp.maximum(acc + shift_ref[0, :], 0.0)                # pad lanes -> relu(0) = 0

        # Transpose on the (otherwise idle) XLU and store only the real Cout channels:
        # lane-dense store, no channel padding reaches HBM, wrapper needs no transpose.
        yt = y.T                                                   # (128, m) f32
        o_ref[...] = yt[:cout, :].reshape(1, cout, m)

    return kernel


@functools.partial(jax.jit, static_argnames=("batch_norm", "eps"))
def single_conv_forward(x_nchw, weight_oihw, bias, gamma, beta, run_mean, run_var,
                        *, batch_norm=True, eps=1e-5):
    N, Cin, H, W = x_nchw.shape
    Cout = weight_oihw.shape[0]
    assert Cout <= 128, "Cout > 128 needs an output-channel grid axis (not implemented)"
    assert W % 8 == 0, "W must be a multiple of 8 for the lane-dense output tiling"

    COUT_PAD = 128                              # matmul N dim (padded); never written to HBM
    K9 = 9 * Cin
    KPAD = ((K9 + 7) // 8) * 8                  # sublane-aligned contraction depth

    # Row-band tile: aim M = TH*W ~= 256 (good MXU fill on v6e/v7x; v5e would prefer ~128),
    # keep TH*W a multiple of 128 so output stores stay unmasked, and pad H so the row-tile
    # grid axis never degenerates to a single whole-image tile.
    r = 128 // math.gcd(W, 128)                 # TH must be a multiple of r
    TH = max(r, (max(1, 256 // W) // r) * r)
    TH = min(TH, -(-H // r) * r)                # don't tile far past the image
    Hpad = -(-H // TH) * TH

    # NCHW -> NHWC, zero-pad spatial (conv padding=1 + H rounding), sublane-align W+2, cast bf16.
    Wp = ((W + 2 + 7) // 8) * 8
    x = jnp.transpose(x_nchw, (0, 2, 3, 1))
    x_pad = jnp.pad(
        x, ((0, 0), (1, 1 + Hpad - H), (1, Wp - (W + 1)), (0, 0))).astype(jnp.bfloat16)

    if bias is None:
        bias = jnp.zeros((Cout,), jnp.float32)
    if batch_norm:
        scale = gamma / jnp.sqrt(run_var + eps)        # eval-mode BN (running stats)
        shift = beta - run_mean * scale + bias * scale
    else:
        scale = jnp.ones((Cout,), jnp.float32)
        shift = bias.astype(jnp.float32)

    # OIHW -> (dy, dx, ci, co) im2col slab, BN scale folded into the weights, zero-padded.
    w2d = jnp.transpose(weight_oihw, (2, 3, 1, 0)).reshape(K9, Cout) * scale[None, :]
    w2d = jnp.pad(w2d, ((0, KPAD - K9), (0, COUT_PAD - Cout))).astype(jnp.bfloat16)
    shift = jnp.pad(shift, (0, COUT_PAD - Cout)).reshape(1, COUT_PAD).astype(jnp.float32)

    kernel = _make_single_conv_kernel(TH, W, Cin, Cout, KPAD)

    out_flat = pl.pallas_call(
        kernel,
        out_shape=jax.ShapeDtypeStruct((N, Cout, Hpad * W), jnp.float32),
        grid_spec=pltpu.PrefetchScalarGridSpec(
            num_scalar_prefetch=0,
            grid=(N, Hpad // TH),
            in_specs=[
                pl.BlockSpec((1, Hpad + 2, Wp, Cin), lambda n, i: (n, 0, 0, 0)),
                pl.BlockSpec((KPAD, COUT_PAD), lambda n, i: (0, 0)),
                pl.BlockSpec((1, COUT_PAD), lambda n, i: (0, 0)),
            ],
            out_specs=pl.BlockSpec((1, Cout, TH * W), lambda n, i: (n, 0, i)),
        ),
        compiler_params=pltpu.CompilerParams(
            dimension_semantics=("parallel", "parallel"),
            vmem_limit_bytes=32 * 1024 * 1024,
        ),
        cost_estimate=pl.CostEstimate(
            flops=2 * N * Hpad * W * K9 * Cout,
            transcendentals=0,
            bytes_accessed=x_pad.size * 2 + w2d.size * 2 + N * Hpad * W * Cout * 4,
        ),
    )(x_pad, w2d, shift)

    # Channels-major flat output: drop padded rows (if any) and reshape — no transpose pass.
    return out_flat[:, :, :H * W].reshape(N, Cout, H, W)


def _reference(x, w, b, gamma, beta, mean, var, eps=1e-5):
    y = jax.lax.conv_general_dilated(
        x, w, window_strides=(1, 1), padding="SAME",
        dimension_numbers=("NCHW", "OIHW", "NCHW"))
    y = y + b[None, :, None, None]
    y = (y - mean[None, :, None, None]) / jnp.sqrt(var[None, :, None, None] + eps)
    y = y * gamma[None, :, None, None] + beta[None, :, None, None]
    return jnp.maximum(y, 0.0)


if __name__ == "__main__":
    N, Cin, Cout, H, W = 2, 4, 8, 16, 16

    key = jax.random.PRNGKey(0)
    kx, kw, kb, kg, kbeta, km, kv = jax.random.split(key, 7)

    x = jax.random.normal(kx, (N, Cin, H, W), jnp.float32)
    # Deterministic parameter init (shapes per nn.Conv2d(in_c, out_c, 3) / nn.BatchNorm2d(out_c))
    weight = jax.random.normal(kw, (Cout, Cin, 3, 3), jnp.float32) * 0.1
    bias = jax.random.normal(kb, (Cout,), jnp.float32) * 0.1
    gamma = 1.0 + 0.1 * jax.random.normal(kg, (Cout,), jnp.float32)
    beta = 0.1 * jax.random.normal(kbeta, (Cout,), jnp.float32)
    run_mean = 0.1 * jax.random.normal(km, (Cout,), jnp.float32)
    run_var = jnp.abs(1.0 + 0.1 * jax.random.normal(kv, (Cout,), jnp.float32))

    out = single_conv_forward(x, weight, bias, gamma, beta, run_mean, run_var,
                              batch_norm=True)
    out = jax.block_until_ready(out)

    ref = _reference(x, weight, bias, gamma, beta, run_mean, run_var)
    assert out.shape == (N, Cout, H, W)
    # bf16 matmul operands (BN scale folded into weights) with f32 accumulation -> loose tolerance.
    assert jnp.allclose(out, ref, atol=3e-2, rtol=3e-2), \
        f"max abs err {jnp.max(jnp.abs(out - ref))}"

    print("KERNEL_OK")
</pallas_src>

<mosaic_0001>
module attributes {stable_mosaic.version = 11 : i64} {
  func.func @kernel(%arg0: i32, %arg1: i32, %arg2: memref<1x18x24x4xbf16, #tpu.memory_space<vmem>>, %arg3: memref<40x128xbf16, #tpu.memory_space<vmem>>, %arg4: memref<1x128xf32, #tpu.memory_space<vmem>>, %arg5: memref<1x8x256xf32, #tpu.memory_space<vmem>>) attributes {dimension_semantics = [#tpu.dimension_semantics<parallel>, #tpu.dimension_semantics<parallel>], iteration_bounds = array<i64: 2, 1>, scalar_prefetch = 0 : i64, scratch_operands = 0 : i64, tpu.core_type = #tpu.core_type<tc>, window_params = [{transform_indices = @transform_0, window_bounds = array<i64: 1, 18, 24, 4>}, {pipeline_mode = #tpu.pipeline_mode<synchronous>, transform_indices = @transform_1, window_bounds = array<i64: 40, 128>}, {pipeline_mode = #tpu.pipeline_mode<synchronous>, transform_indices = @transform_2, window_bounds = array<i64: 1, 128>}, {transform_indices = @transform_3, window_bounds = array<i64: 1, 8, 256>}]} {
    %c16_i32 = arith.constant 16 : i32
    %0 = arith.muli %arg1, %c16_i32 : i32
    %1 = tpu.assume_multiple %0, 8 : i32
    %c0_i32 = arith.constant 0 : i32
    %2 = arith.addi %1, %c0_i32 : i32
    %c0 = arith.constant 0 : index
    %3 = arith.index_cast %2 : i32 to index
    %c0_0 = arith.constant 0 : index
    %c0_1 = arith.constant 0 : index
    %4 = vector.load %arg2[%c0, %3, %c0_0, %c0_1] : memref<1x18x24x4xbf16, #tpu.memory_space<vmem>>, vector<1x16x24x4xbf16>
    %5 = vector.shape_cast %4 : vector<1x16x24x4xbf16> to vector<16x24x4xbf16>
    %6 = vector.extract_strided_slice %5 {offsets = [0, 0, 0], sizes = [16, 16, 4], strides = [1, 1, 1]} : vector<16x24x4xbf16> to vector<16x16x4xbf16>
    %7 = vector.shape_cast %6 : vector<16x16x4xbf16> to vector<256x4xbf16>
    %8 = vector.extract_strided_slice %5 {offsets = [0, 1, 0], sizes = [16, 16, 4], strides = [1, 1, 1]} : vector<16x24x4xbf16> to vector<16x16x4xbf16>
    %9 = vector.shape_cast %8 : vector<16x16x4xbf16> to vector<256x4xbf16>
    %10 = vector.extract_strided_slice %5 {offsets = [0, 2, 0], sizes = [16, 16, 4], strides = [1, 1, 1]} : vector<16x24x4xbf16> to vector<16x16x4xbf16>
    %11 = vector.shape_cast %10 : vector<16x16x4xbf16> to vector<256x4xbf16>
    %c1_i32 = arith.constant 1 : i32
    %12 = arith.addi %1, %c1_i32 : i32
    %c0_2 = arith.constant 0 : index
    %13 = arith.index_cast %12 : i32 to index
    %c0_3 = arith.constant 0 : index
    %c0_4 = arith.constant 0 : index
    %14 = vector.load %arg2[%c0_2, %13, %c0_3, %c0_4] : memref<1x18x24x4xbf16, #tpu.memory_space<vmem>>, vector<1x16x24x4xbf16>
    %15 = vector.shape_cast %14 : vector<1x16x24x4xbf16> to vector<16x24x4xbf16>
    %16 = vector.extract_strided_slice %15 {offsets = [0, 0, 0], sizes = [16, 16, 4], strides = [1, 1, 1]} : vector<16x24x4xbf16> to vector<16x16x4xbf16>
    %17 = vector.shape_cast %16 : vector<16x16x4xbf16> to vector<256x4xbf16>
    %18 = vector.extract_strided_slice %15 {offsets = [0, 1, 0], sizes = [16, 16, 4], strides = [1, 1, 1]} : vector<16x24x4xbf16> to vector<16x16x4xbf16>
    %19 = vector.shape_cast %18 : vector<16x16x4xbf16> to vector<256x4xbf16>
    %20 = vector.extract_strided_slice %15 {offsets = [0, 2, 0], sizes = [16, 16, 4], strides = [1, 1, 1]} : vector<16x24x4xbf16> to vector<16x16x4xbf16>
    %21 = vector.shape_cast %20 : vector<16x16x4xbf16> to vector<256x4xbf16>
    %c2_i32 = arith.constant 2 : i32
    %22 = arith.addi %1, %c2_i32 : i32
    %c0_5 = arith.constant 0 : index
    %23 = arith.index_cast %22 : i32 to index
    %c0_6 = arith.constant 0 : index
    %c0_7 = arith.constant 0 : index
    %24 = vector.load %arg2[%c0_5, %23, %c0_6, %c0_7] : memref<1x18x24x4xbf16, #tpu.memory_space<vmem>>, vector<1x16x24x4xbf16>
    %25 = vector.shape_cast %24 : vector<1x16x24x4xbf16> to vector<16x24x4xbf16>
    %26 = vector.extract_strided_slice %25 {offsets = [0, 0, 0], sizes = [16, 16, 4], strides = [1, 1, 1]} : vector<16x24x4xbf16> to vector<16x16x4xbf16>
    %27 = vector.shape_cast %26 : vector<16x16x4xbf16> to vector<256x4xbf16>
    %28 = vector.extract_strided_slice %25 {offsets = [0, 1, 0], sizes = [16, 16, 4], strides = [1, 1, 1]} : vector<16x24x4xbf16> to vector<16x16x4xbf16>
    %29 = vector.shape_cast %28 : vector<16x16x4xbf16> to vector<256x4xbf16>
    %30 = vector.extract_strided_slice %25 {offsets = [0, 2, 0], sizes = [16, 16, 4], strides = [1, 1, 1]} : vector<16x24x4xbf16> to vector<16x16x4xbf16>
    %31 = vector.shape_cast %30 : vector<16x16x4xbf16> to vector<256x4xbf16>
    %cst = arith.constant 0.000000e+00 : bf16
    %32 = vector.broadcast %cst : bf16 to vector<256x4xbf16>
    %33 = tpu.concatenate %7, %9, %11, %17, %19, %21, %27, %29, %31, %32 in 1 : vector<256x4xbf16>, vector<256x4xbf16>, vector<256x4xbf16>, vector<256x4xbf16>, vector<256x4xbf16>, vector<256x4xbf16>, vector<256x4xbf16>, vector<256x4xbf16>, vector<256x4xbf16>, vector<256x4xbf16> -> vector<256x40xbf16>
    %c0_8 = arith.constant 0 : index
    %c0_9 = arith.constant 0 : index
    %34 = vector.load %arg3[%c0_8, %c0_9] : memref<40x128xbf16, #tpu.memory_space<vmem>>, vector<40x128xbf16>
    %cst_10 = arith.constant dense<0.000000e+00> : vector<256x128xf32>
    %35 = tpu.matmul %33, %34, %cst_10 {dimension_numbers = #tpu.dot_dimension_numbers<[1], [0], [0], [1], [0, 0, 1, 1], [], []>} : vector<256x40xbf16>, vector<40x128xbf16>, vector<256x128xf32> -> vector<256x128xf32>
    %c0_11 = arith.constant 0 : index
    %c0_12 = arith.constant 0 : index
    %36 = vector.load %arg4[%c0_11, %c0_12] : memref<1x128xf32, #tpu.memory_space<vmem>>, vector<1x128xf32>
    %37 = vector.shape_cast %36 : vector<1x128xf32> to vector<128xf32>
    %38 = vector.shape_cast %37 : vector<128xf32> to vector<1x128xf32>
    %39 = vector.broadcast %38 : vector<1x128xf32> to vector<256x128xf32>
    %40 = arith.addf %35, %39 : vector<256x128xf32>
    %cst_13 = arith.constant 0.000000e+00 : f32
    %41 = vector.broadcast %cst_13 : f32 to vector<256x128xf32>
    %42 = arith.maximumf %40, %41 : vector<256x128xf32>
    %43 = tpu.transpose %42, [1, 0] : vector<256x128xf32> -> vector<128x256xf32>
    %44 = vector.extract_strided_slice %43 {offsets = [0, 0], sizes = [8, 256], strides = [1, 1]} : vector<128x256xf32> to vector<8x256xf32>
    %45 = vector.shape_cast %44 : vector<8x256xf32> to vector<1x8x256xf32>
    %c0_14 = arith.constant 0 : index
    %c0_15 = arith.constant 0 : index
    %c0_16 = arith.constant 0 : index
    %46 = vector.load %arg5[%c0_14, %c0_15, %c0_16] : memref<1x8x256xf32, #tpu.memory_space<vmem>>, vector<1x8x256xf32>
    tpu.vector_store %arg5[%c0_14, %c0_15, %c0_16], %45 {strides = array<i32>} : memref<1x8x256xf32, #tpu.memory_space<vmem>>, vector<1x8x256xf32>,
    return
  }
  func.func @transform_0(%arg0: i32, %arg1: i32) -> (i32, i32, i32, i32) {
    %c0_i32 = arith.constant 0 : i32
    %c0_i32_0 = arith.constant 0 : i32
    %c0_i32_1 = arith.constant 0 : i32
    %c0_i32_2 = arith.constant 0 : i32
    return %arg0, %c0_i32, %c0_i32_0, %c0_i32_1 : i32, i32, i32, i32
  }
  func.func @transform_1(%arg0: i32, %arg1: i32) -> (i32, i32) {
    %c0_i32 = arith.constant 0 : i32
    %c0_i32_0 = arith.constant 0 : i32
    %c0_i32_1 = arith.constant 0 : i32
    return %c0_i32, %c0_i32_0 : i32, i32
  }
  func.func @transform_2(%arg0: i32, %arg1: i32) -> (i32, i32) {
    %c0_i32 = arith.constant 0 : i32
    %c0_i32_0 = arith.constant 0 : i32
    %c0_i32_1 = arith.constant 0 : i32
    return %c0_i32, %c0_i32_0 : i32, i32
  }
  func.func @transform_3(%arg0: i32, %arg1: i32) -> (i32, i32, i32) {
    %c0_i32 = arith.constant 0 : i32
    %c0_i32_0 = arith.constant 0 : i32
    return %arg0, %c0_i32, %arg1 : i32, i32, i32
  }
}

</mosaic_0001>

<bundles_post_ra>
// kernel: single_conv_forward.1
= control target key start
LH: loop header
LB: loop body
LE: loop exit
PB: predicated region body
PF: predicated region fallthrough
CT: control target
= control target key end

     0   :  { %s3937_s12 = smov 0   ;;  %s3939_s13 = smov 0   ;;  %s5948_s0 = inlined_call_operand.vmem [shape: bf16[2,18,24,4], index: 0, kind: input, shape index: {}]   ;;  %s5949_s1 = inlined_call_operand.vmem [shape: bf16[40,128], index: 1, kind: input, shape index: {}]   ;;  %s5950_s2 = inlined_call_operand.vmem [shape: f32[1,128], index: 2, kind: input, shape index: {}]   ;;  %s5951_s3 = inlined_call_operand.vmem [shape: f32[2,8,256], index: 3, kind: output, shape index: {}]  }
   0x1   :  { %s3941_s14 = smov 0  }
   0x2 LB: > { %s25_s15 = sadd.s32 1, %s3903_s13  ;;  %p3393_p0 = scmp.ge.s32.totalorder %s3907_s14, 1  ;;  %s3907_s14 = sphi %s3941_s14, %s13_s14   ;;  %s3903_s13 = sphi %s3939_s13, %s5957_s13   ;;  %s3899_s12 = sphi %s3937_s12, %s5956_s12  }
   0x3   : > { %p27_p1 = scmp.ge.s32.totalorder %s25_s15, 2  ;;  %p151_p2 = scmp.lt.s32.totalorder %s3907_s14, 3 }
   0x5   : > { %s5959_s15 = smov (%p27_p1, %s25_s15), 0  ;;  %p152_p3 = pnand %p3393_p0, %p151_p2 }
   0x6   : > { %p179_p4 = scmp.lt.s32.totalorder (!%p152_p3), %s3899_s12, 1  ;;  %vm682_vm0 = vcmask (!%p152_p3), 1042432   ;;  %vm683_vm1 = vcmask (!%p152_p3), 1046532   ;;  %s3909_s20 = smov (!%p152_p3), 12   ;;  %vm247_vm3 = vsmask.f32 (!%p152_p3), 3328 }
   0x7   : > { %155 = sbr.rel (%p152_p3) target bundleno = 758 (0x2f6), region = 32  ;;  %vm4000_vm2 = vmor (!%p152_p3), %vm682_vm0, %vm683_vm1  ;;  %vm248_vm4 = vsmask.f32 (!%p152_p3), 7440  ;;  %s3910_s21 = smov (!%p152_p3), 8   ;;  %vm2677_vm6 = vcmask (!%p152_p3), 31744   ;;  %vm2726_vm7 = vcmask (!%p152_p3), 64512  }
   0x8   : > { %vm4069_vm5 = vmor (!%p152_p3), %vm247_vm3, %vm248_vm4  ;;  %s3911_s22 = smov (!%p152_p3), 4   ;;  %s3912_s23 = smov (!%p152_p3), 16   ;;  %vm2759_vm8 = vcmask (!%p152_p3), 97280   ;;  %vm2792_vm9 = vcmask (!%p152_p3), 130048   ;;  %vm2825_vm10 = vcmask (!%p152_p3), 162816   ;;  %vm2858_vm11 = vcmask (!%p152_p3), 195584  }
   0x9   : > { %s3913_s24 = smov (!%p152_p3), 20   ;;  %s3914_s25 = smov (!%p152_p3), 24   ;;  %vm2891_vm12 = vcmask (!%p152_p3), 228352   ;;  %vm2924_vm13 = vcmask (!%p152_p3), 261120   ;;  %vm2957_vm14 = vcmask (!%p152_p3), 293888   ;;  %vm3002_vm15 = vcmask (!%p152_p3), 326656  }
   0xa   : > { %s3915_s26 = smov (!%p152_p3), 28   ;;  %s3916_s27 = smov (!%p152_p3), 32   ;;  %vm3035_vm0 = vcmask (!%p152_p3), 1043456  }
   0xe   : > { %s5961_s12 = smov (!%p179_p4, %s3899_s12), 1 }
   0xf   : > { %s3773_s16 = smul.u32 216, %s5961_s12  ;;  %s3707_s9 = sshll.u32 %s5961_s12, 4 }
  0x11   : > { %s3961_s19 = scalar_lea.vmem %s5948_s0, %s3773_s16  ;;  %s192_s16 = scalar_lea.vmem %s5951_s3, %s3707_s9 }
  0x12   : > { %v3964_v0 = vld [vmem:[%s3961_s19 + $0x6c] sm:$0xf]  ;;  %v3967_v1 = vld [vmem:[%s3961_s19 + $0x70] sm:$0xf]  ;;  %v3986_v12 = vld [vmem:[%s3961_s19 + $0x60] sm:$0xf] }
  0x13   : > { %v3970_v2 = vld [vmem:[%s3961_s19 + $0xc] sm:$0xf]  ;;  %v1051_v3 = vshll.u32 %v3967_v1, 16  ;;  %v1055_v4 = vshrl.u32 %v3967_v1, 16  ;;  %v3597_v5 = vcombine.low %v3964_v0, %v3967_v1  ;;  %v1042_v6 = vshrl.u32 %v3964_v0, 16 }
  0x14   : > { %v3978_v7 = vld [vmem:[%s3961_s19 + $0x10] sm:$0xf]  ;;  %v1045_v8 = vshll.u32 %v3964_v0, 16  ;;  %v850_v15 = vshrl.u32 %v3970_v2, 16  ;;  %v853_v16 = vshll.u32 %v3970_v2, 16  ;;  %v3405_v22 = vrot.slane %v3986_v12, 9 }
  0x15   : > { %v859_v9 = vshll.u32 %v3978_v7, 16  ;;  %v863_v10 = vshrl.u32 %v3978_v7, 16  ;;  %v3589_v11 = vcombine.low %v3970_v2, %v3978_v7  ;;  %v3988_v13 = vrot.slane %v1055_v4, 4  ;;  %2261 = vrot.lane.b32.xlu1 %v3597_v5, %s3909_s20  ;;  %v3996_v17 = vld [vmem:[%s3961_s19 + $0x64] sm:$0xf] }
  0x16   : > { %v3991_v14 = vrot.slane %v1042_v6, 4  ;;  %v4004_v19 = vrot.slane %v1045_v8, 5  ;;  %v4010_v21 = vld [vmem:[%s3961_s19 + $0x68] sm:$0xf]  ;;  %v743_v23 = vrot.slane %v3996_v17, 5  ;;  %v4014_v24 = vrot.slane %v850_v15, 4 }
  0x17   : > { %v4006_v20 = vrot.slane %v863_v10, 4  ;;  %2245 = vrot.lane.b32.xlu0 %v3589_v11, %s3909_s20  ;;  %v4016_v25 = vrot.slane %v853_v16, 5  ;;  %v746_v26 = vrot.slane %v4010_v21, 5  ;;  %v199_v27 = vld [vmem:[%s3961_s19] sm:$0xf]  ;;  %v443_v28 = vshrl.u32 %v3986_v12, 16 }
  0x18   : > { %v744_v29 = vsel %vm4000_vm2, %v3405_v22, %v743_v23  ;;  %v745_v30 = vrot.slane %v743_v23, 4  ;;  %v4024_v31 = vld [vmem:[%s3961_s19 + $0x4] sm:$0xf]  ;;  %v4027_v32 = vld [vmem:[%s3961_s19 + $0x8] sm:$0xf]  ;;  %v3397_v33 = vrot.slane %v199_v27, 9  ;;  %v1048_v38 = vor.u32 %v4004_v19, %v3991_v14 }
  0x19   : > { %v687_v34 = vrot.slane %v4024_v31, 5  ;;  %v690_v35 = vrot.slane %v4027_v32, 5  ;;  %v4032_v36 = vld [vmem:[%s3961_s19 + $0x6c] sm:$0xf]  ;;  %v4035_v37 = vld [vmem:[%s3961_s19 + $0x70] sm:$0xf]  ;;  %v856_v44 = vor.u32 %v4016_v25, %v4014_v24 }
  0x1a   : > { %v747_v39 = vsel %vm4000_vm2, %v745_v30, %v746_v26  ;;  %v4042_v40 = vld [vmem:[%s3961_s19 + $0x74] sm:$0xf]  ;;  %v3406_v41 = vrot.slane %v4032_v36, 9  ;;  %v750_v42 = vrot.slane %v4035_v37, 5  ;;  %v202_v43 = vld [vmem:[%s3961_s19 + $0xc] sm:$0xf] }
  0x1b   : > { %v3581_v45 = vcombine.low %v744_v29, %v747_v39  ;;  %v688_v46 = vsel %vm4000_vm2, %v3397_v33, %v687_v34  ;;  %v689_v47 = vrot.slane %v687_v34, 4  ;;  %v753_v48 = vrot.slane %v4042_v40, 5  ;;  %v203_v49 = vld [vmem:[%s3961_s19 + $0x10] sm:$0xf]  ;;  %v204_v50 = vld [vmem:[%s3961_s19 + $0x14] sm:$0xf] }
  0x1c   : > { %v751_v51 = vsel %vm4000_vm2, %v3406_v41, %v750_v42  ;;  %v752_v52 = vrot.slane %v750_v42, 4  ;;  %v3398_v53 = vrot.slane %v202_v43, 9  ;;  %v694_v54 = vrot.slane %v203_v49, 5  ;;  %v3875_v18 = vld [vmem:[%s3961_s19 + $0x30] sm:$0xf] }
  0x1d   : > { %2181 = vrot.lane.b32.xlu1 %v3581_v45, %s3910_s21  ;;  %v691_v55 = vsel %vm4000_vm2, %v689_v47, %v690_v35  ;;  %v697_v56 = vrot.slane %v204_v50, 5  ;;  %v275_v57 = vshrl.u32 %v202_v43, 16  ;;  %v278_v58 = vshll.u32 %v202_v43, 16 }
  0x1e   : > { %v3573_v59 = vcombine.low %v688_v46, %v691_v55  ;;  %v754_v60 = vsel %vm4000_vm2, %v752_v52, %v753_v48  ;;  %v695_v61 = vsel %vm4000_vm2, %v3398_v53, %v694_v54  ;;  %v696_v62 = vrot.slane %v694_v54, 4 }
  0x1f   : > { %v3582_v63 = vcombine.low %v751_v51, %v754_v60  ;;  %v277_v4 = vrot.slane %v275_v57, 4  ;;  %v280_v5 = vrot.slane %v278_v58, 5  ;;  %v284_v6 = vshll.u32 %v203_v49, 16 }
  0x20   : > { %2165 = vrot.lane.b32.xlu0 %v3573_v59, %s3910_s21  ;;  %v698_v8 = vsel %vm4000_vm2, %v696_v62, %v697_v56  ;;  %v288_v10 = vshrl.u32 %v203_v49, 16  ;;  %v294_v11 = vshll.u32 %v204_v50, 16  ;;  %v251_v15 = vshrl.u32 %v199_v27, 16 }
  0x21   : > { %2183 = vrot.lane.b32.xlu1 %v3582_v63, %s3910_s21  ;;  %v3574_v16 = vcombine.low %v695_v61, %v698_v8  ;;  %v281_v22 = vor.u32 %v280_v5, %v277_v4  ;;  %v286_v23 = vrot.slane %v284_v6, 5  ;;  %v254_v26 = vshll.u32 %v199_v27, 16  ;;  %v4093_v8 = vld [vmem:[%s3961_s19 + $0x78] sm:$0xf] }
  0x22   : > { %v290_v30 = vrot.slane %v288_v10, 4  ;;  %v296_v33 = vrot.slane %v294_v11, 5  ;;  %v253_v34 = vrot.slane %v251_v15, 4  ;;  %v260_v35 = vshll.u32 %v4024_v31, 16 }
  0x23   : > { %v282_v39 = vrot.slane %v281_v22, 4  ;;  %v256_v41 = vrot.slane %v254_v26, 5  ;;  %v264_v42 = vshrl.u32 %v4024_v31, 16  ;;  %v270_v43 = vshll.u32 %v4027_v32, 16 }
  0x24   : > { %2167 = vrot.lane.b32.xlu0 %v3574_v16, %s3910_s21  ;;  %v291_v27 = vor.u32 %v290_v30, %v286_v23  ;;  %v262_v45 = vrot.slane %v260_v35, 5  ;;  %v467_v46 = vshrl.u32 %v4032_v36, 16  ;;  %v470_v47 = vshll.u32 %v4032_v36, 16  ;;  %v4101_v16 = vld [vmem:[%s3961_s19 + $0x7c] sm:$0xf] }
  0x25   : > { %v287_v48 = vsel %vm4069_vm5, %v282_v39, %v286_v23  ;;  %v257_v49 = vor.u32 %v256_v41, %v253_v34  ;;  %v266_v50 = vrot.slane %v264_v42, 4  ;;  %v272_v51 = vrot.slane %v270_v43, 5  ;;  %v4106_v30 = vld [vmem:[%s3961_s19 + $0x18] sm:$0xf] }
  0x26   : > { %v292_v52 = vrot.slane %v291_v27, 4  ;;  %v469_v53 = vrot.slane %v467_v46, 4  ;;  %v472_v54 = vrot.slane %v470_v47, 5  ;;  %v476_v31 = vshll.u32 %v4035_v37, 16  ;;  %v4118_v27 = vld [vmem:[%s3961_s19 + $0x74] sm:$0xf] }
  0x27   : > { %v258_v32 = vrot.slane %v257_v49, 4  ;;  %v267_v55 = vor.u32 %v266_v50, %v262_v45  ;;  %v480_v56 = vshrl.u32 %v4035_v37, 16  ;;  %v486_v57 = vshll.u32 %v4042_v40, 16  ;;  %v4125_v49 = vld [vmem:[%s3961_s19 + $0x14] sm:$0xf] }
  0x28   : > { %v297_v36 = vsel %vm4069_vm5, %v292_v52, %v296_v33  ;;  %v473_v58 = vor.u32 %v472_v54, %v469_v53  ;;  %v478_v59 = vrot.slane %v476_v31, 5  ;;  %v445_v60 = vrot.slane %v443_v28, 4 }
  0x29   : > { %v3558_v61 = vcombine.low %v287_v48, %v297_v36  ;;  %v263_v62 = vsel %vm4069_vm5, %v258_v32, %v262_v45  ;;  %v268_v63 = vrot.slane %v267_v55, 4  ;;  %v482_v4 = vrot.slane %v480_v56, 4 }
  0x2a   : > { %v474_v5 = vrot.slane %v473_v58, 4  ;;  %v488_v37 = vrot.slane %v486_v57, 5  ;;  %v446_v40 = vshll.u32 %v3986_v12, 16  ;;  %v452_v6 = vshll.u32 %v3996_v17, 16 }
  0x2b   : > { %2087 = vrot.lane.b32.xlu1 %v3558_v61, %s3911_s22  ;;  %v273_v28 = vsel %vm4069_vm5, %v268_v63, %v272_v51  ;;  %v483_v10 = vor.u32 %v482_v4, %v478_v59  ;;  %v456_v11 = vshrl.u32 %v3996_v17, 16  ;;  %v462_v15 = vshll.u32 %v4010_v21, 16  ;;  %v4110_v17 = vld [vmem:[%s3961_s19 + $0x1c] sm:$0xf] }
  0x2c   : > { %v3557_v12 = vcombine.low %v263_v62, %v273_v28  ;;  %v479_v22 = vsel %vm4069_vm5, %v474_v5, %v478_v59  ;;  %v448_v23 = vrot.slane %v446_v40, 5  ;;  %v454_v26 = vrot.slane %v452_v6, 5  ;;  %v4151_v59 = vld [vmem:[%s3961_s19 + $0x80] sm:$0xf] }
  0x2d   : > { %v484_v33 = vrot.slane %v483_v10, 4  ;;  %v458_v34 = vrot.slane %v456_v11, 4  ;;  %v464_v35 = vrot.slane %v462_v15, 5  ;;  %v1066_v39 = vshrl.u32 %v4093_v8, 16  ;;  %v4163_v28 = vld [vmem:[%s3961_s19 + $0x20] sm:$0xf] }
  0x2e   : > { %2085 = vrot.lane.b32.xlu0 %v3557_v12, %s3911_s22  ;;  %v449_v21 = vor.u32 %v448_v23, %v445_v60  ;;  %v1069_v41 = vshll.u32 %v4093_v8, 16  ;;  %v1079_v42 = vshrl.u32 %v4101_v16, 16  ;;  %v3598_v43 = vcombine.low %v4093_v8, %v4101_v16 }
  0x2f   : > { %v489_v45 = vsel %vm4069_vm5, %v484_v33, %v488_v37  ;;  %v459_v46 = vor.u32 %v458_v34, %v454_v26  ;;  %v874_v47 = vshrl.u32 %v4106_v30, 16  ;;  %v877_v48 = vshll.u32 %v4106_v30, 16 }
  0x30   : > { %v3566_v50 = vcombine.low %v479_v22, %v489_v45  ;;  %v450_v51 = vrot.slane %v449_v21, 4  ;;  %v887_v52 = vshrl.u32 %v4110_v17, 16  ;;  %v3590_v53 = vcombine.low %v4106_v30, %v4110_v17 }
  0x31   : > { %v460_v54 = vrot.slane %v459_v46, 4  ;;  %v1049_v31 = vrot.slane %v1048_v38, 4  ;;  %v1053_v32 = vrot.slane %v1051_v3, 5  ;;  %v1061_v55 = vshll.u32 %v4118_v27, 16 }
  0x32   : > { %2103 = vrot.lane.b32.xlu1 %v3566_v50, %s3911_s22  ;;  %v455_v56 = vsel %vm4069_vm5, %v450_v51, %v454_v26  ;;  %v857_v57 = vrot.slane %v856_v44, 4  ;;  %v861_v36 = vrot.slane %v859_v9, 5  ;;  %v869_v14 = vshll.u32 %v4125_v49, 16 }
  0x33   : > { %v465_v19 = vsel %vm4069_vm5, %v460_v54, %v464_v35  ;;  %v1054_v3 = vsel %vm4069_vm5, %v1049_v31, %v1053_v32  ;;  %v1058_v38 = vor.u32 %v3988_v13, %v1053_v32  ;;  %v1063_v58 = vrot.slane %v1061_v55, 5 }
  0x34   : > { %v3565_v60 = vcombine.low %v455_v56, %v465_v19  ;;  %v862_v24 = vsel %vm4069_vm5, %v857_v57, %v861_v36  ;;  %v866_v9 = vor.u32 %v4006_v20, %v861_v36  ;;  %v871_v25 = vrot.slane %v869_v14, 5  ;;  %v4192_v36 = vld [vmem:[%s3961_s19 + $0x78] sm:$0xf] }
  0x35   : > { %v1059_v44 = vrot.slane %v1058_v38, 4  ;;  %v1068_v61 = vrot.slane %v1066_v39, 4  ;;  %v1071_v62 = vrot.slane %v1069_v41, 5  ;;  %v1075_v63 = vshll.u32 %v4101_v16, 16 }
  0x36   : > { %2101 = vrot.lane.b32.xlu0 %v3565_v60, %s3911_s22  ;;  %2263 = vrot.lane.b32.xlu1 %v3598_v43, %s3909_s20  ;;  %v867_v13 = vrot.slane %v866_v9, 4  ;;  %v1081_v4 = vrot.slane %v1079_v42, 4  ;;  %v1085_v5 = vshll.u32 %v4151_v59, 16  ;;  %v876_v37 = vrot.slane %v874_v47, 4 }
  0x37   : > { %v1064_v40 = vsel %vm4069_vm5, %v1059_v44, %v1063_v58  ;;  %v1072_v6 = vor.u32 %v1071_v62, %v1068_v61  ;;  %v1077_v20 = vrot.slane %v1075_v63, 5  ;;  %v879_v10 = vrot.slane %v877_v48, 5  ;;  %v4214_v44 = vld [vmem:[%s3961_s19 + $0x1c] sm:$0xf] }
  0x38   : > { %v3613_v11 = vcombine.low %v1054_v3, %v1064_v40  ;;  %v872_v15 = vsel %vm4069_vm5, %v867_v13, %v871_v25  ;;  %v1087_v12 = vrot.slane %v1085_v5, 5  ;;  %v883_v22 = vshll.u32 %v4110_v17, 16  ;;  %v4200_v3 = vld [vmem:[%s3961_s19 + $0x7c] sm:$0xf]  ;;  %v4222_v13 = vld [vmem:[%s3961_s19 + $0x84] sm:$0xf] }
  0x39   : > { %v3605_v23 = vcombine.low %v862_v24, %v872_v15  ;;  %v1073_v26 = vrot.slane %v1072_v6, 4  ;;  %v1082_v33 = vor.u32 %v1081_v4, %v1077_v20  ;;  %v880_v34 = vor.u32 %v879_v10, %v876_v37  ;;  %v4233_v6 = vld [vmem:[%s3961_s19 + $0x24] sm:$0xf]  ;;  %v4241_v15 = vld [vmem:[%s3961_s19 + $0x28] sm:$0xf] }
  0x3a   : > { %2247 = vrot.lane.b32.xlu0 %v3590_v53, %s3909_s20  ;;  %2341 = vrot.lane.b32.xlu1 %v3613_v11, %s3912_s23  ;;  %v885_v35 = vrot.slane %v883_v22, 5  ;;  %v889_v39 = vrot.slane %v887_v52, 4  ;;  %v893_v21 = vshll.u32 %v4163_v28, 16  ;;  %v3469_v41 = vrot.slane %v3964_v0, 9 }
  0x3b   : > { %v1078_v42 = vsel %vm4069_vm5, %v1073_v26, %v1077_v20  ;;  %v1083_v43 = vrot.slane %v1082_v33, 4  ;;  %v881_v45 = vrot.slane %v880_v34, 4  ;;  %v1339_v46 = vrot.slane %v3967_v1, 5  ;;  %v4249_v33 = vld [vmem:[%s3961_s19 + $0x80] sm:$0xf] }
  0x3c   : > { %v890_v47 = vor.u32 %v889_v39, %v885_v35  ;;  %v895_v48 = vrot.slane %v893_v21, 5  ;;  %v1342_v50 = vrot.slane %v4118_v27, 5  ;;  %v3461_v51 = vrot.slane %v3970_v2, 9 }
  0x3d   : > { %v1088_v52 = vsel %vm4069_vm5, %v1083_v43, %v1087_v12  ;;  %v886_v0 = vsel %vm4069_vm5, %v881_v45, %v885_v35  ;;  %v1340_v53 = vsel %vm4000_vm2, %v3469_v41, %v1339_v46  ;;  %v1341_v54 = vrot.slane %v1339_v46, 4  ;;  %v4261_v46 = vld [vmem:[%s3961_s19 + $0x20] sm:$0xf] }
  0x3e   : > { %2325 = vrot.lane.b32.xlu0 %v3605_v23, %s3912_s23  ;;  %v3614_v1 = vcombine.low %v1078_v42, %v1088_v52  ;;  %v891_v31 = vrot.slane %v890_v47, 4  ;;  %v1283_v32 = vrot.slane %v3978_v7, 5  ;;  %v1286_v27 = vrot.slane %v4125_v49, 5 }
  0x3f   : > { %v1343_v2 = vsel %vm4000_vm2, %v1341_v54, %v1342_v50  ;;  %v3470_v55 = vrot.slane %v4093_v8, 9  ;;  %v1346_v56 = vrot.slane %v4101_v16, 5  ;;  %v1349_v57 = vrot.slane %v4151_v59, 5  ;;  %v4206_v59 = vld [vmem:[%s3961_s19 + $0x18] sm:$0xf] }
  0x40   : > { %2343 = vrot.lane.b32.xlu1 %v3614_v1, %s3912_s23  ;;  %v896_v7 = vsel %vm4069_vm5, %v891_v31, %v895_v48  ;;  %v3629_v14 = vcombine.low %v1340_v53, %v1343_v2  ;;  %v1284_v49 = vsel %vm4000_vm2, %v3461_v51, %v1283_v32  ;;  %v1285_v19 = vrot.slane %v1283_v32, 4 }
  0x41   : > { %v3606_v8 = vcombine.low %v886_v0, %v896_v7  ;;  %v1347_v16 = vsel %vm4000_vm2, %v3470_v55, %v1346_v56  ;;  %v1348_v38 = vrot.slane %v1346_v56, 4  ;;  %v3462_v58 = vrot.slane %v4106_v30, 9 }
  0x42   : > { %v1287_v60 = vsel %vm4000_vm2, %v1285_v19, %v1286_v27  ;;  %v1290_v24 = vrot.slane %v4110_v17, 5  ;;  %v1293_v9 = vrot.slane %v4163_v28, 5  ;;  %v1638_v25 = vshrl.u32 %v4192_v36, 16  ;;  %v4225_v17 = vld [vmem:[%s3961_s19 + $0x88] sm:$0xf] }
  0x43   : > { %2327 = vrot.lane.b32.xlu0 %v3606_v8, %s3912_s23  ;;  %v3621_v61 = vcombine.low %v1284_v49, %v1287_v60  ;;  %v1350_v30 = vsel %vm4000_vm2, %v1348_v38, %v1349_v57  ;;  %v1641_v62 = vshll.u32 %v4192_v36, 16  ;;  %v1651_v63 = vshrl.u32 %v4200_v3, 16  ;;  %v4270_v57 = vld [vmem:[%s3961_s19 + $0x8c] sm:$0xf] }
  0x44   : > { %2421 = vrot.lane.b32.xlu1 %v3629_v14, %s3913_s24  ;;  %v3630_v4 = vcombine.low %v1347_v16, %v1350_v30  ;;  %v1291_v5 = vsel %vm4000_vm2, %v3462_v58, %v1290_v24  ;;  %v1292_v37 = vrot.slane %v1290_v24, 4  ;;  %v3645_v40 = vcombine.low %v4192_v36, %v4200_v3 }
  0x45   : > { %v1446_v20 = vshrl.u32 %v4206_v59, 16  ;;  %v1449_v28 = vshll.u32 %v4206_v59, 16  ;;  %v1459_v10 = vshrl.u32 %v4214_v44, 16  ;;  %v3637_v11 = vcombine.low %v4206_v59, %v4214_v44 }
  0x46   : > { %v1294_v12 = vsel %vm4000_vm2, %v1292_v37, %v1293_v9  ;;  %v1662_v22 = vshrl.u32 %v4222_v13, 16  ;;  %v1665_v23 = vshll.u32 %v4222_v13, 16  ;;  %v1675_v26 = vshrl.u32 %v4225_v17, 16 }
  0x47   : > { %2405 = vrot.lane.b32.xlu0 %v3621_v61, %s3913_s24  ;;  %v3622_v34 = vcombine.low %v1291_v5, %v1294_v12  ;;  %v3646_v35 = vcombine.low %v4222_v13, %v4225_v17  ;;  %v1470_v39 = vshrl.u32 %v4233_v6, 16  ;;  %v1473_v21 = vshll.u32 %v4233_v6, 16 }
  0x48   : > { %2423 = vrot.lane.b32.xlu1 %v3630_v4, %s3913_s24  ;;  %v1483_v41 = vshrl.u32 %v4241_v15, 16  ;;  %v3638_v42 = vcombine.low %v4233_v6, %v4241_v15  ;;  %v1640_v43 = vrot.slane %v1638_v25, 4  ;;  %v1643_v45 = vrot.slane %v1641_v62, 5 }
  0x49   : > { %v1647_v47 = vshll.u32 %v4200_v3, 16  ;;  %v1653_v48 = vrot.slane %v1651_v63, 4  ;;  %v1657_v50 = vshll.u32 %v4249_v33, 16  ;;  %v1448_v51 = vrot.slane %v1446_v20, 4  ;;  %v4283_v20 = vld [vmem:[%s3961_s19 + $0x2c] sm:$0xf] }
  0x4a   : > { %v1644_v52 = vor.u32 %v1643_v45, %v1640_v43  ;;  %v1451_v0 = vrot.slane %v1449_v28, 5  ;;  %v1455_v53 = vshll.u32 %v4214_v44, 16  ;;  %v1461_v54 = vrot.slane %v1459_v10, 4 }
  0x4b   : > { %2407 = vrot.lane.b32.xlu0 %v3622_v34, %s3913_s24  ;;  %v1649_v1 = vrot.slane %v1647_v47, 5  ;;  %v1659_v31 = vrot.slane %v1657_v50, 5  ;;  %v1465_v32 = vshll.u32 %v4261_v46, 16  ;;  %v1664_v27 = vrot.slane %v1662_v22, 4 }
  0x4c   : > { %2501 = vrot.lane.b32.xlu1 %v3645_v40, %s3914_s25  ;;  %v1645_v2 = vrot.slane %v1644_v52, 4  ;;  %v1452_v55 = vor.u32 %v1451_v0, %v1448_v51  ;;  %v1457_v56 = vrot.slane %v1455_v53, 5  ;;  %v1667_v7 = vrot.slane %v1665_v23, 5  ;;  %v4303_v51 = vld [vmem:[%s3961_s19 + $0x7c] sm:$0xf] }
  0x4d   : > { %v1654_v14 = vor.u32 %v1653_v48, %v1649_v1  ;;  %v1467_v49 = vrot.slane %v1465_v32, 5  ;;  %v1671_v19 = vshll.u32 %v4225_v17, 16  ;;  %v1677_v8 = vrot.slane %v1675_v26, 4 }
  0x4e   : > { %v1650_v16 = vsel %vm4069_vm5, %v1645_v2, %v1649_v1  ;;  %v1453_v38 = vrot.slane %v1452_v55, 4  ;;  %v1462_v58 = vor.u32 %v1461_v54, %v1457_v56  ;;  %v1668_v60 = vor.u32 %v1667_v7, %v1664_v27  ;;  %v4314_v1 = vld [vmem:[%s3961_s19 + $0x80] sm:$0xf]  ;;  %v4327_v7 = vld [vmem:[%s3961_s19 + $0x18] sm:$0xf] }
  0x4f   : > { %2485 = vrot.lane.b32.xlu0 %v3637_v11, %s3914_s25  ;;  %v1655_v24 = vrot.slane %v1654_v14, 4  ;;  %v1673_v9 = vrot.slane %v1671_v19, 5  ;;  %v1681_v25 = vshll.u32 %v4270_v57, 16  ;;  %v1472_v61 = vrot.slane %v1470_v39, 4 }
  0x50   : > { %2503 = vrot.lane.b32.xlu1 %v3646_v35, %s3914_s25  ;;  %v1458_v30 = vsel %vm4069_vm5, %v1453_v38, %v1457_v56  ;;  %v1463_v62 = vrot.slane %v1462_v58, 4  ;;  %v1669_v63 = vrot.slane %v1668_v60, 4  ;;  %v1475_v4 = vrot.slane %v1473_v21, 5 }
  0x51   : > { %v1660_v5 = vsel %vm4069_vm5, %v1655_v24, %v1659_v31  ;;  %v1678_v37 = vor.u32 %v1677_v8, %v1673_v9  ;;  %v1683_v40 = vrot.slane %v1681_v25, 5  ;;  %v1479_v28 = vshll.u32 %v4241_v15, 16 }
  0x52   : > { %v3661_v10 = vcombine.low %v1650_v16, %v1660_v5  ;;  %v1468_v11 = vsel %vm4069_vm5, %v1463_v62, %v1467_v49  ;;  %v1674_v12 = vsel %vm4069_vm5, %v1669_v63, %v1673_v9  ;;  %v1476_v22 = vor.u32 %v1475_v4, %v1472_v61  ;;  %v4330_v16 = vld [vmem:[%s3961_s19 + $0x1c] sm:$0xf]  ;;  %v4336_v9 = vld [vmem:[%s3961_s19 + $0x20] sm:$0xf] }
  0x53   : > { %2487 = vrot.lane.b32.xlu0 %v3638_v42, %s3914_s25  ;;  %v3653_v23 = vcombine.low %v1458_v30, %v1468_v11  ;;  %v1679_v26 = vrot.slane %v1678_v37, 4  ;;  %v1481_v34 = vrot.slane %v1479_v28, 5  ;;  %v1485_v35 = vrot.slane %v1483_v41, 4  ;;  %v4300_v41 = vld [vmem:[%s3961_s19 + $0x78] sm:$0xf] }
  0x54   : > { %2581 = vrot.lane.b32.xlu1 %v3661_v10, %s3915_s26  ;;  %v1477_v39 = vrot.slane %v1476_v22, 4  ;;  %v1489_v21 = vshll.u32 %v4283_v20, 16  ;;  %v3533_v43 = vrot.slane %v4192_v36, 9  ;;  %v1935_v45 = vrot.slane %v4200_v3, 5 }
  0x55   : > { %v1684_v47 = vsel %vm4069_vm5, %v1679_v26, %v1683_v40  ;;  %v1486_v42 = vor.u32 %v1485_v35, %v1481_v34  ;;  %v1938_v48 = vrot.slane %v4249_v33, 5  ;;  %v3525_v50 = vrot.slane %v4206_v59, 9 }
  0x56   : > { %v3662_v52 = vcombine.low %v1674_v12, %v1684_v47  ;;  %v1482_v0 = vsel %vm4069_vm5, %v1477_v39, %v1481_v34  ;;  %v1491_v36 = vrot.slane %v1489_v21, 5  ;;  %v1936_v3 = vsel %vm4000_vm2, %v3533_v43, %v1935_v45  ;;  %v4351_v43 = vld [vmem:[%s3961_s19 + $0x84] sm:$0xf] }
  0x57   : > { %2565 = vrot.lane.b32.xlu0 %v3653_v23, %s3915_s26  ;;  %v1487_v53 = vrot.slane %v1486_v42, 4  ;;  %v1937_v54 = vrot.slane %v1935_v45, 4  ;;  %v1879_v33 = vrot.slane %v4214_v44, 5  ;;  %v1882_v59 = vrot.slane %v4261_v46, 5 }
  0x58   : > { %2583 = vrot.lane.b32.xlu1 %v3662_v52, %s3915_s26  ;;  %v491_v31 = vshrl.u32 %v4300_v41, 16  ;;  %v494_v32 = vshll.u32 %v4300_v41, 16  ;;  %v500_v27 = vshll.u32 %v4303_v51, 16  ;;  %v504_v2 = vshrl.u32 %v4303_v51, 16 }
  0x59   : > { %v1492_v55 = vsel %vm4069_vm5, %v1487_v53, %v1491_v36  ;;  %v1939_v44 = vsel %vm4000_vm2, %v1937_v54, %v1938_v48  ;;  %v1880_v46 = vsel %vm4000_vm2, %v3525_v50, %v1879_v33  ;;  %v1881_v56 = vrot.slane %v1879_v33, 4  ;;  %v4358_v48 = vld [vmem:[%s3961_s19 + $0x88] sm:$0xf]  ;;  %v4371_v33 = vld [vmem:[%s3961_s19 + $0x8c] sm:$0xf] }
  0x5a   : > { %v3654_v14 = vcombine.low %v1482_v0, %v1492_v55  ;;  %v3677_v49 = vcombine.low %v1936_v3, %v1939_v44  ;;  %v493_v19 = vrot.slane %v491_v31, 4  ;;  %v496_v8 = vrot.slane %v494_v32, 5  ;;  %v4383_v55 = vld [vmem:[%s3961_s19 + $0x28] sm:$0xf] }
  0x5b   : > { %v1883_v38 = vsel %vm4000_vm2, %v1881_v56, %v1882_v59  ;;  %v502_v58 = vrot.slane %v500_v27, 5  ;;  %v506_v60 = vrot.slane %v504_v2, 4  ;;  %v510_v24 = vshll.u32 %v4314_v1, 16 }
  0x5c   : > { %2567 = vrot.lane.b32.xlu0 %v3654_v14, %s3915_s26  ;;  %2661 = vrot.lane.b32.xlu1 %v3677_v49, %s3916_s27  ;;  %v3669_v25 = vcombine.low %v1880_v46, %v1883_v38  ;;  %v497_v61 = vor.u32 %v496_v8, %v493_v19  ;;  %v299_v30 = vshrl.u32 %v4327_v7, 16  ;;  %v302_v62 = vshll.u32 %v4327_v7, 16  ;;  %v4390_v38 = vld [vmem:[%s3961_s19 + $0x2c] sm:$0xf] }
  0x5d   : > { %v507_v63 = vor.u32 %v506_v60, %v502_v58  ;;  %v512_v4 = vrot.slane %v510_v24, 5  ;;  %v308_v5 = vshll.u32 %v4330_v16, 16  ;;  %v312_v37 = vshrl.u32 %v4330_v16, 16 }
  0x5e   : > { %v498_v40 = vrot.slane %v497_v61, 4  ;;  %v301_v28 = vrot.slane %v299_v30, 4  ;;  %v304_v10 = vrot.slane %v302_v62, 5  ;;  %v318_v11 = vshll.u32 %v4336_v9, 16 }
  0x5f   : > { %v508_v12 = vrot.slane %v507_v63, 4  ;;  %v310_v22 = vrot.slane %v308_v5, 5  ;;  %v314_v23 = vrot.slane %v312_v37, 4  ;;  %v3534_v26 = vrot.slane %v4222_v13, 9 }
  0x60   : > { %2645 = vrot.lane.b32.xlu0 %v3669_v25, %s3916_s27  ;;  %v503_v34 = vsel %vm4069_vm5, %v498_v40, %v502_v58  ;;  %v305_v35 = vor.u32 %v304_v10, %v301_v28  ;;  %v320_v39 = vrot.slane %v318_v11, 5  ;;  %v1942_v21 = vrot.slane %v4225_v17, 5 }
  0x61   : > { %v513_v45 = vsel %vm4069_vm5, %v508_v12, %v512_v4  ;;  %v315_v47 = vor.u32 %v314_v23, %v310_v22  ;;  %v1945_v42 = vrot.slane %v4270_v57, 5  ;;  %v3526_v13 = vrot.slane %v4233_v6, 9  ;;  %v3832_v23 = vld [vmem:[%s5949_s1] sm:$0xff]  }
  0x62   : > { %v3567_v50 = vcombine.low %v503_v34, %v513_v45  ;;  %v306_v52 = vrot.slane %v305_v35, 4  ;;  %v1943_v0 = vsel %vm4000_vm2, %v3534_v26, %v1942_v21  ;;  %v1944_v17 = vrot.slane %v1942_v21, 4  ;;  %3727 = vmatprep.subr.bf16.mxu0 %v3832_v23  ;;  %3765 = vmatprep.subr.bf16.mxu1 %v3832_v23 }
  0x63   : > { %v316_v36 = vrot.slane %v315_v47, 4  ;;  %v1886_v3 = vrot.slane %v4241_v15, 5  ;;  %v1889_v53 = vrot.slane %v4283_v20, 5  ;;  %v515_v54 = vshrl.u32 %v4351_v43, 16  ;;  %v4376_v15 = vld [vmem:[%s3961_s19 + $0x24] sm:$0xf]  ;;  %3728 = vmatpush3.bf16.msra.mxu0 %v3832_v23  ;;  %3768 = vmatpush3.bf16.msra.mxu1 %v3832_v23 }
  0x64   : > { %2105 = vrot.lane.b32.xlu1 %v3567_v50, %s3911_s22  ;;  %v311_v6 = vsel %vm4069_vm5, %v306_v52, %v310_v22  ;;  %v1946_v57 = vsel %vm4000_vm2, %v1944_v17, %v1945_v42  ;;  %v518_v59 = vshll.u32 %v4351_v43, 16  ;;  %v524_v31 = vshll.u32 %v4358_v48, 16 }
  0x65   : > { %v321_v20 = vsel %vm4069_vm5, %v316_v36, %v320_v39  ;;  %v3678_v32 = vcombine.low %v1943_v0, %v1946_v57  ;;  %v1887_v27 = vsel %vm4000_vm2, %v3526_v13, %v1886_v3  ;;  %v1888_v2 = vrot.slane %v1886_v3, 4 }
  0x66   : > { %v3559_v44 = vcombine.low %v311_v6, %v321_v20  ;;  %v517_v46 = vrot.slane %v515_v54, 4  ;;  %v520_v56 = vrot.slane %v518_v59, 5  ;;  %v526_v14 = vrot.slane %v524_v31, 5  ;;  %v4433_v59 = vld [vmem:[%s3961_s19 + $0x88] sm:$0xf] }
  0x67   : > { %v1890_v49 = vsel %vm4000_vm2, %v1888_v2, %v1889_v53  ;;  %v528_v19 = vshrl.u32 %v4358_v48, 16  ;;  %v534_v8 = vshll.u32 %v4371_v33, 16  ;;  %v323_v58 = vshrl.u32 %v4376_v15, 16  ;;  %v4426_v53 = vld [vmem:[%s3961_s19 + $0x84] sm:$0xf] }
  0x68   : > { %2089 = vrot.lane.b32.xlu0 %v3559_v44, %s3911_s22  ;;  %2663 = vrot.lane.b32.xlu1 %v3678_v32, %s3916_s27  ;;  %v3670_v60 = vcombine.low %v1887_v27, %v1890_v49  ;;  %v521_v24 = vor.u32 %v520_v56, %v517_v46  ;;  %v326_v25 = vshll.u32 %v4376_v15, 16  ;;  %v332_v61 = vshll.u32 %v4383_v55, 16  ;;  %v4440_v2 = vld [vmem:[%s3961_s19 + $0x24] sm:$0xf] }
  0x69   : > { %v530_v30 = vrot.slane %v528_v19, 4  ;;  %v536_v62 = vrot.slane %v534_v8, 5  ;;  %v325_v63 = vrot.slane %v323_v58, 4  ;;  %v336_v4 = vshrl.u32 %v4383_v55, 16  ;;  %v4455_v19 = vld [vmem:[%s3961_s19 + $0x90] sm:$0xf] }
  0x6a   : > { %v522_v5 = vrot.slane %v521_v24, 4  ;;  %v328_v37 = vrot.slane %v326_v25, 5  ;;  %v334_v40 = vrot.slane %v332_v61, 5  ;;  %v342_v28 = vshll.u32 %v4390_v38, 16  ;;  %v4464_v24 = vld [vmem:[%s3961_s19 + $0x94] sm:$0xf] }
  0x6b   : > { %v531_v10 = vor.u32 %v530_v30, %v526_v14  ;;  %v338_v11 = vrot.slane %v336_v4, 4  ;;  %v3407_v12 = vrot.slane %v4300_v41, 9  ;;  %v757_v22 = vrot.slane %v4303_v51, 5  ;;  %v4467_v25 = vld [vmem:[%s3961_s19 + $0x30] sm:$0xf] }
  0x6c   : > { %2647 = vrot.lane.b32.xlu0 %v3670_v60, %s3916_s27  ;;  %v527_v26 = vsel %vm4069_vm5, %v522_v5, %v526_v14  ;;  %v329_v34 = vor.u32 %v328_v37, %v325_v63  ;;  %v344_v35 = vrot.slane %v342_v28, 5  ;;  %v760_v39 = vrot.slane %v4314_v1, 5  ;;  %v4475_v4 = vld [vmem:[%s3961_s19 + $0x34] sm:$0xf] }
  0x6d   : > { %v532_v21 = vrot.slane %v531_v10, 4  ;;  %v339_v45 = vor.u32 %v338_v11, %v334_v40  ;;  %v758_v41 = vsel %vm4000_vm2, %v3407_v12, %v757_v22  ;;  %v759_v47 = vrot.slane %v757_v22, 4  ;;  %v4482_v10 = vld [vmem:[%s3961_s19 + $0x8c] sm:$0xf] }
  0x6e   : > { %v330_v51 = vrot.slane %v329_v34, 4  ;;  %v3399_v42 = vrot.slane %v4327_v7, 9  ;;  %v701_v13 = vrot.slane %v4330_v16, 5  ;;  %v704_v50 = vrot.slane %v4336_v9, 5  ;;  %v3835_v7 = vld [vmem:[%s5949_s1 + $0x8] sm:$0xff]  }
  0x6f   : > { %v537_v1 = vsel %vm4069_vm5, %v532_v21, %v536_v62  ;;  %v340_v52 = vrot.slane %v339_v45, 4  ;;  %v761_v0 = vsel %vm4000_vm2, %v759_v47, %v760_v39  ;;  %v3408_v17 = vrot.slane %v4351_v43, 9  ;;  %3729 = vmatprep.subr.bf16.mxu0 %v3835_v7  ;;  %3766 = vmatprep.subr.bf16.mxu1 %v3835_v7  ;;  %v4494_v21 = vld [vmem:[%s3961_s19 + $0x2c] sm:$0xf] }
  0x70   : > { %v3568_v36 = vcombine.low %v527_v26, %v537_v1  ;;  %v335_v16 = vsel %vm4069_vm5, %v330_v51, %v334_v40  ;;  %v3583_v9 = vcombine.low %v758_v41, %v761_v0  ;;  %v702_v3 = vsel %vm4000_vm2, %v3399_v42, %v701_v13  ;;  %3730 = vmatpush3.bf16.msra.mxu0 %v3835_v7 }
  0x71   : > { %v345_v54 = vsel %vm4069_vm5, %v340_v52, %v344_v35  ;;  %v703_v6 = vrot.slane %v701_v13, 4  ;;  %v764_v43 = vrot.slane %v4358_v48, 5  ;;  %v767_v57 = vrot.slane %v4371_v33, 5  ;;  %3769 = vmatpush3.bf16.msra.mxu1 %v3835_v7 }
  0x72   : > { %2107 = vrot.lane.b32.xlu1 %v3568_v36, %s3911_s22  ;;  %v3560_v31 = vcombine.low %v335_v16, %v345_v54  ;;  %v3400_v20 = vrot.slane %v4376_v15, 9  ;;  %v708_v32 = vrot.slane %v4383_v55, 5  ;;  %v711_v27 = vrot.slane %v4390_v38, 5  ;;  %v4448_v15 = vld [vmem:[%s3961_s19 + $0x28] sm:$0xf] }
  0x73   : > { %v705_v48 = vsel %vm4000_vm2, %v703_v6, %v704_v50  ;;  %v765_v33 = vsel %vm4000_vm2, %v3408_v17, %v764_v43  ;;  %v766_v44 = vrot.slane %v764_v43, 4  ;;  %v1090_v46 = vshrl.u32 %v4426_v53, 16 }
  0x74   : > { %2091 = vrot.lane.b32.xlu0 %v3560_v31, %s3911_s22  ;;  %v3575_v55 = vcombine.low %v702_v3, %v705_v48  ;;  %v709_v56 = vsel %vm4000_vm2, %v3400_v20, %v708_v32  ;;  %v710_v14 = vrot.slane %v708_v32, 4  ;;  %v1093_v49 = vshll.u32 %v4426_v53, 16  ;;  %v4503_v3 = vld [vmem:[%s3961_s19 + $0x98] sm:$0xf] }
  0x75   : > { %v768_v8 = vsel %vm4000_vm2, %v766_v44, %v767_v57  ;;  %v1103_v38 = vshrl.u32 %v4433_v59, 16  ;;  %v3599_v58 = vcombine.low %v4426_v53, %v4433_v59  ;;  %v898_v60 = vshrl.u32 %v4440_v2, 16 }
  0x76   : > { %2185 = vrot.lane.b32.xlu1 %v3583_v9, %s3910_s21  ;;  %v3584_v61 = vcombine.low %v765_v33, %v768_v8  ;;  %v712_v30 = vsel %vm4000_vm2, %v710_v14, %v711_v27  ;;  %v901_v62 = vshll.u32 %v4440_v2, 16  ;;  %v911_v63 = vshrl.u32 %v4448_v15, 16 }
  0x77   : > { %v3576_v5 = vcombine.low %v709_v56, %v712_v30  ;;  %v3591_v37 = vcombine.low %v4440_v2, %v4448_v15  ;;  %v1114_v40 = vshrl.u32 %v4455_v19, 16  ;;  %v1117_v28 = vshll.u32 %v4455_v19, 16 }
  0x78   : > { %2169 = vrot.lane.b32.xlu0 %v3575_v55, %s3910_s21  ;;  %v1127_v11 = vshrl.u32 %v4464_v24, 16  ;;  %v3600_v12 = vcombine.low %v4455_v19, %v4464_v24  ;;  %v922_v22 = vshrl.u32 %v4467_v25, 16  ;;  %v925_v23 = vshll.u32 %v4467_v25, 16 }
  0x79   : > { %v935_v26 = vshrl.u32 %v4475_v4, 16  ;;  %v3592_v34 = vcombine.low %v4467_v25, %v4475_v4  ;;  %v1092_v35 = vrot.slane %v1090_v46, 4  ;;  %v1095_v39 = vrot.slane %v1093_v49, 5 }
  0x7a   : > { %2187 = vrot.lane.b32.xlu1 %v3584_v61, %s3910_s21  ;;  %v1099_v45 = vshll.u32 %v4433_v59, 16  ;;  %v1105_v41 = vrot.slane %v1103_v38, 4  ;;  %v1109_v47 = vshll.u32 %v4482_v10, 16  ;;  %v900_v51 = vrot.slane %v898_v60, 4  ;;  %v4517_v61 = vld [vmem:[%s3961_s19 + $0x38] sm:$0xf] }
  0x7b   : > { %v1096_v42 = vor.u32 %v1095_v39, %v1092_v35  ;;  %v903_v13 = vrot.slane %v901_v62, 5  ;;  %v907_v50 = vshll.u32 %v4448_v15, 16  ;;  %v913_v1 = vrot.slane %v911_v63, 4 }
  0x7c   : > { %2171 = vrot.lane.b32.xlu0 %v3576_v5, %s3910_s21  ;;  %v1101_v52 = vrot.slane %v1099_v45, 5  ;;  %v1111_v0 = vrot.slane %v1109_v47, 5  ;;  %v917_v17 = vshll.u32 %v4494_v21, 16  ;;  %v1116_v7 = vrot.slane %v1114_v40, 4 }
  0x7d   : > { %v1097_v36 = vrot.slane %v1096_v42, 4  ;;  %v904_v16 = vor.u32 %v903_v13, %v900_v51  ;;  %v909_v9 = vrot.slane %v907_v50, 5  ;;  %v1119_v54 = vrot.slane %v1117_v28, 5 }
  0x7e   : > { %2265 = vrot.lane.b32.xlu1 %v3599_v58, %s3909_s20  ;;  %v1106_v6 = vor.u32 %v1105_v41, %v1101_v52  ;;  %v919_v43 = vrot.slane %v917_v17, 5  ;;  %v1123_v57 = vshll.u32 %v4464_v24, 16  ;;  %v1129_v31 = vrot.slane %v1127_v11, 4  ;;  %v4545_v17 = vld [vmem:[%s3961_s19 + $0x90] sm:$0xf] }
  0x7f   : > { %v1102_v20 = vsel %vm4069_vm5, %v1097_v36, %v1101_v52  ;;  %v905_v32 = vrot.slane %v904_v16, 4  ;;  %v914_v27 = vor.u32 %v913_v1, %v909_v9  ;;  %v1120_v48 = vor.u32 %v1119_v54, %v1116_v7 }
  0x80   : > { %2249 = vrot.lane.b32.xlu0 %v3591_v37, %s3909_s20  ;;  %v1107_v33 = vrot.slane %v1106_v6, 4  ;;  %v1125_v44 = vrot.slane %v1123_v57, 5  ;;  %v1133_v46 = vshll.u32 %v4503_v3, 16  ;;  %v924_v55 = vrot.slane %v922_v22, 4 }
  0x81   : > { %v910_v56 = vsel %vm4069_vm5, %v905_v32, %v909_v9  ;;  %v915_v14 = vrot.slane %v914_v27, 4  ;;  %v1121_v49 = vrot.slane %v1120_v48, 4  ;;  %v927_v8 = vrot.slane %v925_v23, 5 }
  0x82   : > { %2267 = vrot.lane.b32.xlu1 %v3600_v12, %s3909_s20  ;;  %v1112_v38 = vsel %vm4069_vm5, %v1107_v33, %v1111_v0  ;;  %v1130_v58 = vor.u32 %v1129_v31, %v1125_v44  ;;  %v1135_v60 = vrot.slane %v1133_v46, 5  ;;  %v931_v30 = vshll.u32 %v4475_v4, 16  ;;  %v4568_v31 = vld [vmem:[%s3961_s19 + $0x34] sm:$0xf]  ;;  %v4578_v33 = vld [vmem:[%s3961_s19 + $0x9c] sm:$0xf] }
  0x83   : > { %v3615_v62 = vcombine.low %v1102_v20, %v1112_v38  ;;  %v920_v63 = vsel %vm4069_vm5, %v915_v14, %v919_v43  ;;  %v1126_v5 = vsel %vm4069_vm5, %v1121_v49, %v1125_v44  ;;  %v928_v37 = vor.u32 %v927_v8, %v924_v55  ;;  %v4581_v44 = vld [vmem:[%s3961_s19 + $0xa0] sm:$0xf]  ;;  %v4589_v49 = vld [vmem:[%s3961_s19 + $0x3c] sm:$0xf] }
  0x84   : > { %2251 = vrot.lane.b32.xlu0 %v3592_v34, %s3909_s20  ;;  %v3607_v40 = vcombine.low %v910_v56, %v920_v63  ;;  %v1131_v28 = vrot.slane %v1130_v58, 4  ;;  %v933_v11 = vrot.slane %v931_v30, 5  ;;  %v937_v12 = vrot.slane %v935_v26, 4 }
  0x85   : > { %v929_v22 = vrot.slane %v928_v37, 4  ;;  %v941_v23 = vshll.u32 %v4517_v61, 16  ;;  %v3471_v35 = vrot.slane %v4426_v53, 9  ;;  %v1353_v39 = vrot.slane %v4433_v59, 5  ;;  %v4605_v37 = vld [vmem:[%s3961_s19 + $0x98] sm:$0xf] }
  0x86   : > { %2345 = vrot.lane.b32.xlu1 %v3615_v62, %s3912_s23  ;;  %v1136_v45 = vsel %vm4069_vm5, %v1131_v28, %v1135_v60  ;;  %v938_v41 = vor.u32 %v937_v12, %v933_v11  ;;  %v1356_v34 = vrot.slane %v4482_v10, 5  ;;  %v3463_v47 = vrot.slane %v4440_v2, 9 }
  0x87   : > { %v3616_v51 = vcombine.low %v1126_v5, %v1136_v45  ;;  %v934_v26 = vsel %vm4069_vm5, %v929_v22, %v933_v11  ;;  %v943_v42 = vrot.slane %v941_v23, 5  ;;  %v1354_v53 = vsel %vm4000_vm2, %v3471_v35, %v1353_v39  ;;  %v4570_v20 = vpop.permute.xlu1 %2261 }
  0x88   : > { %2329 = vrot.lane.b32.xlu0 %v3607_v40, %s3912_s23  ;;  %v939_v59 = vrot.slane %v938_v41, 4  ;;  %v1355_v13 = vrot.slane %v1353_v39, 4  ;;  %v1297_v50 = vrot.slane %v4448_v15, 5  ;;  %v1300_v1 = vrot.slane %v4494_v21, 5  ;;  %v4619_v41 = vld [vmem:[%s3961_s19 + $0x38] sm:$0xf] }
  0x89   : > { %v3472_v2 = vrot.slane %v4455_v19, 9  ;;  %v1360_v10 = vrot.slane %v4464_v24, 5  ;;  %v1363_v52 = vrot.slane %v4503_v3, 5  ;;  %v3464_v0 = vrot.slane %v4467_v25, 9  ;;  %v4555_v24 = vld [vmem:[%s3961_s19 + $0x94] sm:$0xf]  ;;  %v4607_v40 = vpop.permute.xlu0 %2245 }
  0x8a   : > { %2347 = vrot.lane.b32.xlu1 %v3616_v51, %s3912_s23  ;;  %v944_v7 = vsel %vm4069_vm5, %v939_v59, %v943_v42  ;;  %v1357_v15 = vsel %vm4000_vm2, %v1355_v13, %v1356_v34  ;;  %v1298_v19 = vsel %vm4000_vm2, %v3463_v47, %v1297_v50  ;;  %v1299_v21 = vrot.slane %v1297_v50, 4  ;;  %v4560_v3 = vld [vmem:[%s3961_s19 + $0x30] sm:$0xf] }
  0x8b   : > { %v3608_v36 = vcombine.low %v934_v26, %v944_v7  ;;  %v3631_v25 = vcombine.low %v1354_v53, %v1357_v15  ;;  %v1361_v16 = vsel %vm4000_vm2, %v3472_v2, %v1360_v10  ;;  %v1362_v9 = vrot.slane %v1360_v10, 4 }
  0x8c   : > { %v1301_v54 = vsel %vm4000_vm2, %v1299_v21, %v1300_v1  ;;  %v1304_v6 = vrot.slane %v4475_v4, 5  ;;  %v1307_v43 = vrot.slane %v4517_v61, 5  ;;  %v1686_v57 = vshrl.u32 %v4545_v17, 16  ;;  %v4597_v61 = vld [vmem:[%s3961_s19 + $0x40] sm:$0xf] }
  0x8d   : > { %2331 = vrot.lane.b32.xlu0 %v3608_v36, %s3912_s23  ;;  %v3623_v32 = vcombine.low %v1298_v19, %v1301_v54  ;;  %v1364_v27 = vsel %vm4000_vm2, %v1362_v9, %v1363_v52  ;;  %v1689_v48 = vshll.u32 %v4545_v17, 16  ;;  %v1699_v4 = vshrl.u32 %v4555_v24, 16  ;;  %v4630_v19 = vld [vmem:[%s3961_s19 + $0xa4] sm:$0xf] }
  0x8e   : > { %2425 = vrot.lane.b32.xlu1 %v3631_v25, %s3913_s24  ;;  %v3632_v46 = vcombine.low %v1361_v16, %v1364_v27  ;;  %v1305_v55 = vsel %vm4000_vm2, %v3464_v0, %v1304_v6  ;;  %v1306_v56 = vrot.slane %v1304_v6, 4  ;;  %v3647_v14 = vcombine.low %v4545_v17, %v4555_v24 }
  0x8f   : > { %v1494_v8 = vshrl.u32 %v4560_v3, 16  ;;  %v1497_v38 = vshll.u32 %v4560_v3, 16  ;;  %v1507_v58 = vshrl.u32 %v4568_v31, 16  ;;  %v3639_v60 = vcombine.low %v4560_v3, %v4568_v31  ;;  %v4621_v34 = vpop.permute.xlu1 %2181 }
  0x90   : > { %v1308_v30 = vsel %vm4000_vm2, %v1306_v56, %v1307_v43  ;;  %v1710_v62 = vshrl.u32 %v4578_v33, 16  ;;  %v1713_v63 = vshll.u32 %v4578_v33, 16  ;;  %v1723_v5 = vshrl.u32 %v4581_v44, 16 }
  0x91   : > { %2409 = vrot.lane.b32.xlu0 %v3623_v32, %s3913_s24  ;;  %v3624_v28 = vcombine.low %v1305_v55, %v1308_v30  ;;  %v3648_v11 = vcombine.low %v4578_v33, %v4581_v44  ;;  %v1518_v12 = vshrl.u32 %v4589_v49, 16  ;;  %v1521_v22 = vshll.u32 %v4589_v49, 16 }
  0x92   : > { %2427 = vrot.lane.b32.xlu1 %v3632_v46, %s3913_s24  ;;  %v1531_v23 = vshrl.u32 %v4597_v61, 16  ;;  %v3640_v35 = vcombine.low %v4589_v49, %v4597_v61  ;;  %v1688_v39 = vrot.slane %v1686_v57, 4  ;;  %v1691_v45 = vrot.slane %v1689_v48, 5  ;;  %v4632_v36 = vpop.permute.xlu0 %2165 }
  0x93   : > { %v1695_v47 = vshll.u32 %v4555_v24, 16  ;;  %v1701_v51 = vrot.slane %v1699_v4, 4  ;;  %v1705_v26 = vshll.u32 %v4605_v37, 16  ;;  %v1496_v42 = vrot.slane %v1494_v8, 4  ;;  %v4637_v27 = vpop.permute.xlu1 %2183 }
  0x94   : > { %v1692_v53 = vor.u32 %v1691_v45, %v1688_v39  ;;  %v1499_v59 = vrot.slane %v1497_v38, 5  ;;  %v1503_v13 = vshll.u32 %v4568_v31, 16  ;;  %v1509_v50 = vrot.slane %v1507_v58, 4 }
  0x95   : > { %2411 = vrot.lane.b32.xlu0 %v3624_v28, %s3913_s24  ;;  %v1697_v1 = vrot.slane %v1695_v47, 5  ;;  %v1707_v2 = vrot.slane %v1705_v26, 5  ;;  %v1513_v10 = vshll.u32 %v4619_v41, 16  ;;  %v1712_v52 = vrot.slane %v1710_v62, 4 }
  0x96   : > { %2505 = vrot.lane.b32.xlu1 %v3647_v14, %s3914_s25  ;;  %v1693_v0 = vrot.slane %v1692_v53, 4  ;;  %v1500_v7 = vor.u32 %v1499_v59, %v1496_v42  ;;  %v1505_v15 = vrot.slane %v1503_v13, 5  ;;  %v1715_v21 = vrot.slane %v1713_v63, 5  ;;  %v4647_v63 = vld [vmem:[%s3961_s19 + $0x44] sm:$0xf]  ;;  %v4654_v39 = vpop.permute.xlu0 %2167 }
  0x97   : > { %v1702_v25 = vor.u32 %v1701_v51, %v1697_v1  ;;  %v1515_v16 = vrot.slane %v1513_v10, 5  ;;  %v1719_v9 = vshll.u32 %v4581_v44, 16  ;;  %v1725_v54 = vrot.slane %v1723_v5, 4  ;;  %v4671_v10 = vld [vmem:[%s3961_s19 + $0x94] sm:$0xf] }
  0x98   : > { %v1698_v6 = vsel %vm4069_vm5, %v1693_v0, %v1697_v1  ;;  %v1501_v43 = vrot.slane %v1500_v7, 4  ;;  %v1510_v57 = vor.u32 %v1509_v50, %v1505_v15  ;;  %v1716_v32 = vor.u32 %v1715_v21, %v1712_v52  ;;  %v4682_v21 = vld [vmem:[%s3961_s19 + $0x98] sm:$0xf] }
  0x99   : > { %2489 = vrot.lane.b32.xlu0 %v3639_v60, %s3914_s25  ;;  %v1703_v48 = vrot.slane %v1702_v25, 4  ;;  %v1721_v4 = vrot.slane %v1719_v9, 5  ;;  %v1729_v46 = vshll.u32 %v4630_v19, 16  ;;  %v1520_v55 = vrot.slane %v1518_v12, 4 }
  0x9a   : > { %2507 = vrot.lane.b32.xlu1 %v3648_v11, %s3914_s25  ;;  %v1506_v56 = vsel %vm4069_vm5, %v1501_v43, %v1505_v15  ;;  %v1511_v14 = vrot.slane %v1510_v57, 4  ;;  %v1717_v8 = vrot.slane %v1716_v32, 4  ;;  %v1523_v38 = vrot.slane %v1521_v22, 5  ;;  %v4697_v32 = vld [vmem:[%s3961_s19 + $0x30] sm:$0xf] }
  0x9b   : > { %v1708_v58 = vsel %vm4069_vm5, %v1703_v48, %v1707_v2  ;;  %v1726_v30 = vor.u32 %v1725_v54, %v1721_v4  ;;  %v1731_v62 = vrot.slane %v1729_v46, 5  ;;  %v1527_v60 = vshll.u32 %v4597_v61, 16  ;;  %v4668_v2 = vld [vmem:[%s3961_s19 + $0x90] sm:$0xf] }
  0x9c   : > { %v3663_v5 = vcombine.low %v1698_v6, %v1708_v58  ;;  %v1516_v28 = vsel %vm4069_vm5, %v1511_v14, %v1515_v16  ;;  %v1722_v11 = vsel %vm4069_vm5, %v1717_v8, %v1721_v4  ;;  %v1524_v12 = vor.u32 %v1523_v38, %v1520_v55 }
  0x9d   : > { %2491 = vrot.lane.b32.xlu0 %v3640_v35, %s3914_s25  ;;  %v3655_v22 = vcombine.low %v1506_v56, %v1516_v28  ;;  %v1727_v45 = vrot.slane %v1726_v30, 4  ;;  %v1529_v47 = vrot.slane %v1527_v60, 5  ;;  %v1533_v51 = vrot.slane %v1531_v23, 4  ;;  %v4661_v13 = vpop.permute.xlu1 %2087  ;;  %v4700_v56 = vld [vmem:[%s3961_s19 + $0x34] sm:$0xf] }
  0x9e   : > { %2585 = vrot.lane.b32.xlu1 %v3663_v5, %s3915_s26  ;;  %v1525_v26 = vrot.slane %v1524_v12, 4  ;;  %v1537_v42 = vshll.u32 %v4647_v63, 16  ;;  %v3535_v53 = vrot.slane %v4545_v17, 9  ;;  %v1949_v59 = vrot.slane %v4555_v24, 5 }
  0x9f   : > { %v1732_v50 = vsel %vm4069_vm5, %v1727_v45, %v1731_v62  ;;  %v1534_v35 = vor.u32 %v1533_v51, %v1529_v47  ;;  %v1952_v1 = vrot.slane %v4605_v37, 5  ;;  %v3527_v23 = vrot.slane %v4560_v3, 9  ;;  %v4708_v62 = vld [vmem:[%s3961_s19 + $0x38] sm:$0xf] }
  0xa0   : > { %v3664_v52 = vcombine.low %v1722_v11, %v1732_v50  ;;  %v1530_v17 = vsel %vm4069_vm5, %v1525_v26, %v1529_v47  ;;  %v1539_v24 = vrot.slane %v1537_v42, 5  ;;  %v1950_v0 = vsel %vm4000_vm2, %v3535_v53, %v1949_v59  ;;  %v4688_v6 = vpop.permute.xlu0 %2085 }
  0xa1   : > { %2569 = vrot.lane.b32.xlu0 %v3655_v22, %s3915_s26  ;;  %v1535_v7 = vrot.slane %v1534_v35, 4  ;;  %v1951_v15 = vrot.slane %v1949_v59, 4  ;;  %v1893_v37 = vrot.slane %v4568_v31, 5  ;;  %v1896_v3 = vrot.slane %v4619_v41, 5 }
  0xa2   : > { %2587 = vrot.lane.b32.xlu1 %v3664_v52, %s3915_s26  ;;  %v539_v25 = vshrl.u32 %v4668_v2, 16  ;;  %v542_v16 = vshll.u32 %v4668_v2, 16  ;;  %v548_v9 = vshll.u32 %v4671_v10, 16  ;;  %v552_v54 = vshrl.u32 %v4671_v10, 16  ;;  %v3857_v52 = vld [vmem:[%s3961_s19 + $0xc] sm:$0xf] }
  0xa3   : > { %v1540_v31 = vsel %vm4069_vm5, %v1535_v7, %v1539_v24  ;;  %v1953_v41 = vsel %vm4000_vm2, %v1951_v15, %v1952_v1  ;;  %v1894_v43 = vsel %vm4000_vm2, %v3527_v23, %v1893_v37  ;;  %v1895_v57 = vrot.slane %v1893_v37, 4 }
  0xa4   : > { %v3656_v48 = vcombine.low %v1530_v17, %v1540_v31  ;;  %v3679_v4 = vcombine.low %v1950_v0, %v1953_v41  ;;  %v541_v46 = vrot.slane %v539_v25, 4  ;;  %v544_v55 = vrot.slane %v542_v16, 5  ;;  %v4702_v14 = vpop.permute.xlu1 %2103  ;;  %v3858_v17 = vld [vmem:[%s3961_s19 + $0x10] sm:$0xf] }
  0xa5   : > { %v1897_v8 = vsel %vm4000_vm2, %v1895_v57, %v1896_v3  ;;  %v550_v38 = vrot.slane %v548_v9, 5  ;;  %v554_v58 = vrot.slane %v552_v54, 4  ;;  %v558_v30 = vshll.u32 %v4682_v21, 16 }
  0xa6   : > { %2571 = vrot.lane.b32.xlu0 %v3656_v48, %s3915_s26  ;;  %2665 = vrot.lane.b32.xlu1 %v3679_v4, %s3916_s27  ;;  %v3671_v60 = vcombine.low %v1894_v43, %v1897_v8  ;;  %v545_v5 = vor.u32 %v544_v55, %v541_v46  ;;  %v347_v28 = vshrl.u32 %v4697_v32, 16  ;;  %v350_v11 = vshll.u32 %v4697_v32, 16  ;;  %v3859_v4 = vld [vmem:[%s3961_s19] sm:$0xf]  ;;  %v3860_v46 = vld [vmem:[%s3961_s19 + $0x4] sm:$0xf] }
  0xa7   : > { %v555_v12 = vor.u32 %v554_v58, %v550_v38  ;;  %v560_v22 = vrot.slane %v558_v30, 5  ;;  %v356_v45 = vshll.u32 %v4700_v56, 16  ;;  %v360_v47 = vshrl.u32 %v4700_v56, 16 }
  0xa8   : > { %v546_v51 = vrot.slane %v545_v5, 4  ;;  %v349_v26 = vrot.slane %v347_v28, 4  ;;  %v352_v42 = vrot.slane %v350_v11, 5  ;;  %v366_v53 = vshll.u32 %v4708_v62, 16  ;;  %v4717_v59 = vpop.permute.xlu0 %2101  ;;  %v4719_v50 = vpop.permute.xlu1 %2263  ;;  %v3861_v28 = vld [vmem:[%s3961_s19 + $0x6c] sm:$0xf] }
  0xa9   : > { %v556_v35 = vrot.slane %v555_v12, 4  ;;  %v358_v1 = vrot.slane %v356_v45, 5  ;;  %v362_v23 = vrot.slane %v360_v47, 4  ;;  %v3542_v24 = vcombine.low %v3857_v52, %v3858_v17  ;;  %v3862_v11 = vld [vmem:[%s3961_s19 + $0x70] sm:$0xf] }
  0xaa   : > { %2649 = vrot.lane.b32.xlu0 %v3671_v60, %s3916_s27  ;;  %v551_v0 = vsel %vm4069_vm5, %v546_v51, %v550_v38  ;;  %v353_v7 = vor.u32 %v352_v42, %v349_v26  ;;  %v368_v3 = vrot.slane %v366_v53, 5  ;;  %v3536_v9 = vrot.slane %v4578_v33, 9  ;;  %v4755_v60 = vld [vmem:[%s3961_s19 + $0xa0] sm:$0xf]  ;;  %v4766_v45 = vld [vmem:[%s3961_s19 + $0xa4] sm:$0xf] }
  0xab   : > { %v561_v15 = vsel %vm4069_vm5, %v556_v35, %v560_v22  ;;  %v363_v37 = vor.u32 %v362_v23, %v358_v1  ;;  %v4735_v43 = vsel %vm2677_vm6, %v3542_v24, %v4661_v13  ;;  %v1956_v57 = vrot.slane %v4581_v44, 5  ;;  %v4747_v13 = vld [vmem:[%s3961_s19 + $0x9c] sm:$0xf]  ;;  %v3863_v53 = vld [vmem:[%s3961_s19 + $0x60] sm:$0xf] }
  0xac   : > { %v3569_v25 = vcombine.low %v551_v0, %v561_v15  ;;  %v354_v16 = vrot.slane %v353_v7, 4  ;;  %v4729_v54 = vpop.permute.xlu0 %2247  ;;  %v4731_v31 = vpop.permute.xlu1 %2341  ;;  %v1959_v48 = vrot.slane %v4630_v19, 5  ;;  %v3541_v55 = vcombine.low %v3859_v4, %v3860_v46  ;;  %v3864_v35 = vld [vmem:[%s3961_s19 + $0x64] sm:$0xf]  ;;  %v4777_v52 = vld [vmem:[%s3961_s19 + $0x3c] sm:$0xf] }
  0xad   : > { %v364_v41 = vrot.slane %v363_v37, 4  ;;  %v3528_v8 = vrot.slane %v4589_v49, 9  ;;  %v1900_v38 = vrot.slane %v4597_v61, 5  ;;  %v1957_v19 = vsel %vm4000_vm2, %v3536_v9, %v1956_v57  ;;  %v4780_v17 = vld [vmem:[%s3961_s19 + $0x40] sm:$0xf] }
  0xae   : > { %2109 = vrot.lane.b32.xlu1 %v3569_v25, %s3911_s22  ;;  %v359_v33 = vsel %vm4069_vm5, %v354_v16, %v358_v1  ;;  %v1958_v58 = vrot.slane %v1956_v57, 4  ;;  %v1903_v30 = vrot.slane %v4647_v63, 5  ;;  %v3550_v12 = vcombine.low %v3861_v28, %v3862_v11 }
  0xaf   : > { %v369_v44 = vsel %vm4069_vm5, %v364_v41, %v368_v3  ;;  %v1901_v49 = vsel %vm4000_vm2, %v3528_v8, %v1900_v38  ;;  %v1902_v61 = vrot.slane %v1900_v38, 4  ;;  %v563_v47 = vshrl.u32 %v4747_v13, 16  ;;  %v4787_v3 = vld [vmem:[%s3961_s19 + $0x44] sm:$0xf] }
  0xb0   : > { %v3561_v5 = vcombine.low %v359_v33, %v369_v44  ;;  %v4761_v22 = vpop.permute.xlu0 %2325  ;;  %v1960_v63 = vsel %vm4000_vm2, %v1958_v58, %v1959_v48  ;;  %v566_v51 = vshll.u32 %v4747_v13, 16  ;;  %v3549_v1 = vcombine.low %v3863_v53, %v3864_v35 }
  0xb1   : > { %v3680_v26 = vcombine.low %v1957_v19, %v1960_v63  ;;  %v1904_v42 = vsel %vm4000_vm2, %v1902_v61, %v1903_v30  ;;  %v572_v23 = vshll.u32 %v4755_v60, 16  ;;  %v2680_v0 = vsel %vm2677_vm6, %v3541_v55, %v4688_v6 }
  0xb2   : > { %2093 = vrot.lane.b32.xlu0 %v3561_v5, %s3911_s22  ;;  %v4782_v24 = vpop.permute.xlu1 %2343  ;;  %v3672_v7 = vcombine.low %v1901_v49, %v1904_v42  ;;  %v565_v15 = vrot.slane %v563_v47, 4  ;;  %v568_v37 = vrot.slane %v566_v51, 5  ;;  %v2707_v25 = vsel %vm2677_vm6, %v3550_v12, %v4702_v14 }
  0xb3   : > { %2667 = vrot.lane.b32.xlu1 %v3680_v26, %s3916_s27  ;;  %v574_v16 = vrot.slane %v572_v23, 5  ;;  %v576_v9 = vshrl.u32 %v4755_v60, 16  ;;  %v582_v41 = vshll.u32 %v4766_v45, 16  ;;  %v371_v48 = vshrl.u32 %v4777_v52, 16 }
  0xb4   : > { %v569_v57 = vor.u32 %v568_v37, %v565_v15  ;;  %v374_v6 = vshll.u32 %v4777_v52, 16  ;;  %v380_v33 = vshll.u32 %v4780_v17, 16  ;;  %v2704_v46 = vsel %vm2677_vm6, %v3549_v1, %v4717_v59 }
  0xb5   : > { %v4797_v4 = vpop.permute.xlu0 %2327  ;;  %v578_v14 = vrot.slane %v576_v9, 4  ;;  %v384_v55 = vshrl.u32 %v4780_v17, 16  ;;  %v390_v8 = vshll.u32 %v4787_v3, 16  ;;  %v373_v19 = vrot.slane %v371_v48, 4 }
  0xb6   : > { %2651 = vrot.lane.b32.xlu0 %v3672_v7, %s3916_s27  ;;  %v4804_v38 = vpop.permute.xlu1 %2421  ;;  %v570_v44 = vrot.slane %v569_v57, 4  ;;  %v376_v58 = vrot.slane %v374_v6, 5  ;;  %v382_v30 = vrot.slane %v380_v33, 5  ;;  %v2728_v5 = vsel %vm2726_vm7, %v2680_v0, %v4632_v36 }
  0xb7   : > { %v579_v49 = vor.u32 %v578_v14, %v574_v16  ;;  %v584_v61 = vrot.slane %v582_v41, 5  ;;  %v386_v28 = vrot.slane %v384_v55, 4  ;;  %v2744_v59 = vsel %vm2726_vm7, %v2704_v46, %v4621_v34 }
  0xb8   : > { %v377_v11 = vor.u32 %v376_v58, %v373_v19  ;;  %v392_v12 = vrot.slane %v390_v8, 5  ;;  %v2746_v63 = vsel %vm2726_vm7, %v2707_v25, %v4637_v27  ;;  %v575_v51 = vsel %vm4069_vm5, %v570_v44, %v574_v16  ;;  %v4862_v58 = vld [vmem:[%s3961_s19 + $0x9c] sm:$0xf] }
  0xb9   : > { %v4812_v47 = vpop.permute.xlu0 %2405  ;;  %v580_v26 = vrot.slane %v579_v49, 4  ;;  %v387_v42 = vor.u32 %v386_v28, %v382_v30  ;;  %v3409_v35 = vrot.slane %v4668_v2, 9  ;;  %v771_v34 = vrot.slane %v4671_v10, 5 }
  0xba   : > { %v4816_v36 = vpop.permute.xlu1 %2423  ;;  %v378_v53 = vrot.slane %v377_v11, 4  ;;  %v774_v1 = vrot.slane %v4682_v21, 5  ;;  %v3401_v0 = vrot.slane %v4697_v32, 9  ;;  %v715_v7 = vrot.slane %v4700_v56, 5  ;;  %v4898_v11 = vld [vmem:[%s3961_s19 + $0xa8] sm:$0xf] }
  0xbb   : > { %v585_v27 = vsel %vm4069_vm5, %v580_v26, %v584_v61  ;;  %v388_v23 = vrot.slane %v387_v42, 4  ;;  %v772_v25 = vsel %vm4000_vm2, %v3409_v35, %v771_v34  ;;  %v773_v2 = vrot.slane %v771_v34, 4  ;;  %v4883_v61 = vld [vmem:[%s3961_s19 + $0x3c] sm:$0xf]  ;;  %v4908_v26 = vld [vmem:[%s3961_s19 + $0xac] sm:$0xf] }
  0xbc   : > { %v3570_v15 = vcombine.low %v575_v51, %v585_v27  ;;  %v383_v37 = vsel %vm4069_vm5, %v378_v53, %v382_v30  ;;  %v716_v21 = vsel %vm4000_vm2, %v3401_v0, %v715_v7  ;;  %v717_v9 = vrot.slane %v715_v7, 4  ;;  %v4911_v42 = vld [vmem:[%s3961_s19 + $0x48] sm:$0xf]  ;;  %v4918_v27 = vld [vmem:[%s3961_s19 + $0x4c] sm:$0xf] }
  0xbd   : > { %v4829_v16 = vpop.permute.xlu0 %2407  ;;  %v393_v10 = vsel %vm4069_vm5, %v388_v23, %v392_v12  ;;  %v718_v32 = vrot.slane %v4708_v62, 5  ;;  %v2779_v57 = vsel %vm2759_vm8, %v2746_v63, %v4719_v50  ;;  %v2730_v48 = vsel %vm2726_vm7, %v4735_v43, %v4654_v39 }
  0xbe   : > { %v4836_v56 = vpop.permute.xlu1 %2501  ;;  %2111 = vrot.lane.b32.xlu1 %v3570_v15, %s3911_s22  ;;  %v3562_v41 = vcombine.low %v383_v37, %v393_v10  ;;  %v775_v6 = vsel %vm4000_vm2, %v773_v2, %v774_v1  ;;  %v2763_v33 = vsel %vm2759_vm8, %v2730_v48, %v4729_v54  ;;  %v2777_v50 = vsel %vm2759_vm8, %v2744_v59, %v4570_v20  ;;  %v4895_v59 = vld [vmem:[%s3961_s19 + $0x40] sm:$0xf]  ;;  %v4930_v37 = vld [vmem:[%s3961_s19 + $0xa4] sm:$0xf] }
  0xbf   : > { %v3585_v62 = vcombine.low %v772_v25, %v775_v6  ;;  %v719_v46 = vsel %vm4000_vm2, %v717_v9, %v718_v32  ;;  %v3410_v39 = vrot.slane %v4747_v13, 9  ;;  %v778_v43 = vrot.slane %v4755_v60, 5  ;;  %v4947_v48 = vld [vmem:[%s3961_s19 + $0x44] sm:$0xf] }
  0xc0   : > { %2095 = vrot.lane.b32.xlu0 %v3562_v41, %s3911_s22  ;;  %v3577_v14 = vcombine.low %v716_v21, %v719_v46  ;;  %v781_v54 = vrot.slane %v4766_v45, 5  ;;  %v3402_v8 = vrot.slane %v4777_v52, 9  ;;  %v722_v44 = vrot.slane %v4780_v17, 5  ;;  %v4874_v52 = vld [vmem:[%s3961_s19 + $0xa0] sm:$0xf] }
  0xc1   : > { %v4855_v55 = vpop.permute.xlu0 %2485  ;;  %v725_v19 = vrot.slane %v4787_v3, 5  ;;  %v2810_v20 = vsel %vm2792_vm9, %v2777_v50, %v4731_v31  ;;  %v2761_v13 = vsel %vm2759_vm8, %v2728_v5, %v4607_v40  ;;  %v779_v60 = vsel %vm4000_vm2, %v3410_v39, %v778_v43 }
  0xc2   : > { %v4864_v30 = vpop.permute.xlu1 %2503  ;;  %2189 = vrot.lane.b32.xlu1 %v3585_v62, %s3910_s21  ;;  %v780_v45 = vrot.slane %v778_v43, 4  ;;  %v2794_v17 = vsel %vm2792_vm9, %v2761_v13, %v4761_v22  ;;  %v723_v3 = vsel %vm4000_vm2, %v3402_v8, %v722_v44  ;;  %v724_v49 = vrot.slane %v722_v44, 4 }
  0xc3   : > { %v2812_v31 = vsel %vm2792_vm9, %v2779_v57, %v4782_v24  ;;  %v4890_v5 = vsel %vm2792_vm9, %v2763_v33, %v4797_v4  ;;  %v1138_v22 = vshrl.u32 %v4862_v58, 16  ;;  %v1141_v28 = vshll.u32 %v4862_v58, 16 }
  0xc4   : > { %2173 = vrot.lane.b32.xlu0 %v3577_v14, %s3910_s21  ;;  %v782_v40 = vsel %vm4000_vm2, %v780_v45, %v781_v54  ;;  %v726_v63 = vsel %vm4000_vm2, %v724_v49, %v725_v19  ;;  %v1151_v51 = vshrl.u32 %v4874_v52, 16  ;;  %v3601_v4 = vcombine.low %v4862_v58, %v4874_v52 }
  0xc5   : > { %v4900_v24 = vpop.permute.xlu0 %2487  ;;  %v3586_v12 = vcombine.low %v779_v60, %v782_v40  ;;  %v3578_v35 = vcombine.low %v723_v3, %v726_v63  ;;  %v946_v34 = vshrl.u32 %v4883_v61, 16  ;;  %v949_v1 = vshll.u32 %v4883_v61, 16 }
  0xc6   : > { %v4913_v53 = vpop.permute.xlu1 %2581  ;;  %v959_v23 = vshrl.u32 %v4895_v59, 16  ;;  %v3593_v0 = vcombine.low %v4883_v61, %v4895_v59  ;;  %v4926_v7 = vsel %vm2825_vm10, %v2810_v20, %v4804_v38  ;;  %v1162_v15 = vshrl.u32 %v4898_v11, 16 }
  0xc7   : > { %2191 = vrot.lane.b32.xlu1 %v3586_v12, %s3910_s21  ;;  %v4935_v25 = vsel %vm2825_vm10, %v2794_v17, %v4812_v47  ;;  %v1165_v2 = vshll.u32 %v4898_v11, 16  ;;  %v1175_v10 = vshrl.u32 %v4908_v26, 16  ;;  %v3602_v21 = vcombine.low %v4898_v11, %v4908_v26 }
  0xc8   : > { %2175 = vrot.lane.b32.xlu0 %v3578_v35, %s3910_s21  ;;  %v970_v38 = vshrl.u32 %v4911_v42, 16  ;;  %v973_v32 = vshll.u32 %v4911_v42, 16  ;;  %v983_v41 = vshrl.u32 %v4918_v27, 16  ;;  %v1140_v57 = vrot.slane %v1138_v22, 4  ;;  %v4966_v22 = vld [vmem:[%s3961_s19 + $0xb0] sm:$0xf] }
  0xc9   : > { %v4941_v9 = vpop.permute.xlu0 %2565  ;;  %v1143_v47 = vrot.slane %v1141_v28, 5  ;;  %v1147_v6 = vshll.u32 %v4874_v52, 16  ;;  %v1153_v33 = vrot.slane %v1151_v51, 4  ;;  %v1157_v62 = vshll.u32 %v4930_v37, 16 }
  0xca   : > { %v948_v46 = vrot.slane %v946_v34, 4  ;;  %v951_v14 = vrot.slane %v949_v1, 5  ;;  %v955_v50 = vshll.u32 %v4895_v59, 16  ;;  %v961_v39 = vrot.slane %v959_v23, 4  ;;  %v4953_v43 = vpop.permute.xlu1 %2583 }
  0xcb   : > { %2269 = vrot.lane.b32.xlu1 %v3601_v4, %s3909_s20  ;;  %v3594_v54 = vcombine.low %v4911_v42, %v4918_v27  ;;  %v1144_v8 = vor.u32 %v1143_v47, %v1140_v57  ;;  %v1149_v44 = vrot.slane %v1147_v6, 5  ;;  %v965_v19 = vshll.u32 %v4947_v48, 16  ;;  %v4981_v57 = vld [vmem:[%s3961_s19 + $0x50] sm:$0xf] }
  0xcc   : > { %2253 = vrot.lane.b32.xlu0 %v3593_v0, %s3909_s20  ;;  %v4961_v20 = vsel %vm2825_vm10, %v2812_v31, %v4816_v36  ;;  %v952_v13 = vor.u32 %v951_v14, %v948_v46  ;;  %v957_v60 = vrot.slane %v955_v50, 5  ;;  %v1164_v45 = vrot.slane %v1162_v15, 4 }
  0xcd   : > { %v1145_v3 = vrot.slane %v1144_v8, 4  ;;  %v1154_v49 = vor.u32 %v1153_v33, %v1149_v44  ;;  %v1159_v40 = vrot.slane %v1157_v62, 5  ;;  %v967_v63 = vrot.slane %v965_v19, 5 }
  0xce   : > { %v4963_v17 = vpop.permute.xlu0 %2567  ;;  %v953_v28 = vrot.slane %v952_v13, 4  ;;  %v962_v12 = vor.u32 %v961_v39, %v957_v60  ;;  %v1167_v51 = vrot.slane %v1165_v2, 5  ;;  %v1171_v4 = vshll.u32 %v4908_v26, 16  ;;  %v4976_v15 = vpop.permute.xlu1 %2661 }
  0xcf   : > { %2271 = vrot.lane.b32.xlu1 %v3602_v21, %s3909_s20  ;;  %v1150_v36 = vsel %vm4069_vm5, %v1145_v3, %v1149_v44  ;;  %v1155_v31 = vrot.slane %v1154_v49, 4  ;;  %v1177_v35 = vrot.slane %v1175_v10, 4  ;;  %v1181_v0 = vshll.u32 %v4966_v22, 16 }
  0xd0   : > { %2255 = vrot.lane.b32.xlu0 %v3594_v54, %s3909_s20  ;;  %v958_v34 = vsel %vm4069_vm5, %v953_v28, %v957_v60  ;;  %v963_v1 = vrot.slane %v962_v12, 4  ;;  %v1168_v23 = vor.u32 %v1167_v51, %v1164_v45  ;;  %v1173_v21 = vrot.slane %v1171_v4, 5 }
  0xd1   : > { %v1160_v2 = vsel %vm4069_vm5, %v1155_v31, %v1159_v40  ;;  %v972_v47 = vrot.slane %v970_v38, 4  ;;  %v975_v6 = vrot.slane %v973_v32, 5  ;;  %v1183_v46 = vrot.slane %v1181_v0, 5 }
  0xd2   : > { %v3617_v33 = vcombine.low %v1150_v36, %v1160_v2  ;;  %v968_v10 = vsel %vm4069_vm5, %v963_v1, %v967_v63  ;;  %v1169_v62 = vrot.slane %v1168_v23, 4  ;;  %v4985_v14 = vpop.permute.xlu0 %2645  ;;  %v1178_v39 = vor.u32 %v1177_v35, %v1173_v21 }
  0xd3   : > { %v3609_v50 = vcombine.low %v958_v34, %v968_v10  ;;  %v976_v54 = vor.u32 %v975_v6, %v972_v47  ;;  %v979_v8 = vshll.u32 %v4918_v27, 16  ;;  %v2829_v44 = vsel %vm2825_vm10, %v4890_v5, %v4829_v16  ;;  %v5042_v6 = vld [vmem:[%s3961_s19 + $0xa8] sm:$0xf]  ;;  %v5052_v10 = vld [vmem:[%s3961_s19 + $0xac] sm:$0xf] }
  0xd4   : > { %2349 = vrot.lane.b32.xlu1 %v3617_v33, %s3912_s23  ;;  %v2876_v38 = vsel %vm2858_vm11, %v4926_v7, %v4836_v56  ;;  %v985_v32 = vrot.slane %v983_v41, 4  ;;  %v989_v19 = vshll.u32 %v4981_v57, 16  ;;  %v1174_v13 = vsel %vm4069_vm5, %v1169_v62, %v1173_v21 }
  0xd5   : > { %2333 = vrot.lane.b32.xlu0 %v3609_v50, %s3912_s23  ;;  %v1179_v60 = vrot.slane %v1178_v39, 4  ;;  %v977_v45 = vrot.slane %v976_v54, 4  ;;  %v981_v3 = vrot.slane %v979_v8, 5  ;;  %v2860_v16 = vsel %vm2858_vm11, %v4935_v25, %v4855_v55 }
  0xd6   : > { %v3473_v5 = vrot.slane %v4862_v58, 9  ;;  %v1367_v49 = vrot.slane %v4874_v52, 5  ;;  %v1370_v56 = vrot.slane %v4930_v37, 5  ;;  %v5005_v7 = vpop.permute.xlu1 %2105  ;;  %v991_v28 = vrot.slane %v989_v19, 5 }
  0xd7   : > { %v1184_v41 = vsel %vm4069_vm5, %v1179_v60, %v1183_v46  ;;  %v986_v40 = vor.u32 %v985_v32, %v981_v3  ;;  %v3465_v12 = vrot.slane %v4883_v61, 9  ;;  %v1311_v58 = vrot.slane %v4895_v59, 5  ;;  %v5080_v32 = vld [vmem:[%s3961_s19 + $0xb8] sm:$0xf]  ;;  %v5089_v60 = vld [vmem:[%s3961_s19 + $0x54] sm:$0xf] }
  0xd8   : > { %v3618_v63 = vcombine.low %v1174_v13, %v1184_v41  ;;  %v1368_v51 = vsel %vm4000_vm2, %v3473_v5, %v1367_v49  ;;  %v1369_v55 = vrot.slane %v1367_v49, 4  ;;  %v982_v52 = vsel %vm4069_vm5, %v977_v45, %v981_v3  ;;  %v5098_v49 = vld [vmem:[%s3961_s19 + $0x58] sm:$0xf] }
  0xd9   : > { %v987_v37 = vrot.slane %v986_v40, 4  ;;  %v1314_v36 = vrot.slane %v4947_v48, 5  ;;  %v3474_v31 = vrot.slane %v4898_v11, 9  ;;  %v2878_v61 = vsel %vm2858_vm11, %v4961_v20, %v4864_v30 }
  0xda   : > { %v5013_v25 = vpop.permute.xlu0 %2089  ;;  %2351 = vrot.lane.b32.xlu1 %v3618_v63, %s3912_s23  ;;  %v1371_v4 = vsel %vm4000_vm2, %v1369_v55, %v1370_v56  ;;  %v1313_v59 = vrot.slane %v1311_v58, 4  ;;  %v1312_v48 = vsel %vm4000_vm2, %v3465_v12, %v1311_v58  ;;  %v1374_v11 = vrot.slane %v4908_v26, 5  ;;  %v5034_v0 = vpop.permute.xlu1 %2663 }
  0xdb   : > { %v992_v35 = vsel %vm4069_vm5, %v987_v37, %v991_v28  ;;  %v3633_v34 = vcombine.low %v1368_v51, %v1371_v4  ;;  %v1377_v20 = vrot.slane %v4966_v22, 5  ;;  %v3466_v23 = vrot.slane %v4911_v42, 9 }
  0xdc   : > { %v3610_v1 = vcombine.low %v982_v52, %v992_v35  ;;  %v1315_v30 = vsel %vm4000_vm2, %v1313_v59, %v1314_v36  ;;  %v2862_v2 = vsel %vm2858_vm11, %v2829_v44, %v4900_v24  ;;  %v1375_v21 = vsel %vm4000_vm2, %v3474_v31, %v1374_v11  ;;  %v5117_v36 = vld [vmem:[%s3961_s19 + $0xb0] sm:$0xf] }
  0xdd   : > { %v1376_v47 = vrot.slane %v1374_v11, 4  ;;  %v1318_v26 = vrot.slane %v4918_v27, 5  ;;  %v3625_v22 = vcombine.low %v1312_v48, %v1315_v30  ;;  %v2909_v42 = vsel %vm2891_vm12, %v2876_v38, %v4913_v53  ;;  %v5055_v27 = vld [vmem:[%s3961_s19 + $0x48] sm:$0xf]  ;;  %v5077_v38 = vld [vmem:[%s3961_s19 + $0xb4] sm:$0xf] }
  0xde   : > { %2335 = vrot.lane.b32.xlu0 %v3610_v1, %s3912_s23  ;;  %2429 = vrot.lane.b32.xlu1 %v3633_v34, %s3913_s24  ;;  %v2893_v24 = vsel %vm2891_vm12, %v2860_v16, %v4941_v9  ;;  %v1321_v33 = vrot.slane %v4981_v57, 5  ;;  %v5057_v62 = vpop.permute.xlu0 %2647  ;;  %v5065_v39 = vsel %vm2891_vm12, %v2878_v61, %v4953_v43  ;;  %v5068_v9 = vld [vmem:[%s3961_s19 + $0x4c] sm:$0xf]  ;;  %v5072_v54 = vsel %vm2891_vm12, %v2862_v2, %v4963_v17  ;;  %v5124_v35 = vld [vmem:[%s3961_s19 + $0x50] sm:$0xf] }
  0xdf   : > { %v1378_v46 = vsel %vm4000_vm2, %v1376_v47, %v1377_v20  ;;  %v1319_v50 = vsel %vm4000_vm2, %v3466_v23, %v1318_v26  ;;  %v1320_v53 = vrot.slane %v1318_v26, 4  ;;  %v1734_v8 = vshrl.u32 %v5042_v6, 16  ;;  %v5136_v48 = vld [vmem:[%s3961_s19 + $0x7c] sm:$0xf]  ;;  %v3838_v20 = vld [vmem:[%s5949_s1 + $0x10] ss:$0 sps:$4 sm:$0xff]  }
  0xe0   : > { %v3634_v57 = vcombine.low %v1375_v21, %v1378_v46  ;;  %v1737_v44 = vshll.u32 %v5042_v6, 16  ;;  %v1747_v19 = vshrl.u32 %v5052_v10, 16  ;;  %v3649_v13 = vcombine.low %v5042_v6, %v5052_v10  ;;  %3771 = vmatprep.subr.msk.bf16.mxu0 %vm3035_vm0, %v3838_v20  ;;  %3772 = vmatprep.subr.msk.bf16.mxu1 %vm3035_vm0, %v3838_v20 }
  0xe1   : > { %v1322_v43 = vsel %vm4000_vm2, %v1320_v53, %v1321_v33  ;;  %v1542_v17 = vshrl.u32 %v5055_v27, 16  ;;  %v1545_v3 = vshll.u32 %v5055_v27, 16  ;;  %v1555_v16 = vshrl.u32 %v5068_v9, 16 }
  0xe2   : > { %2413 = vrot.lane.b32.xlu0 %v3625_v22, %s3913_s24  ;;  %2431 = vrot.lane.b32.xlu1 %v3634_v57, %s3913_s24  ;;  %v3626_v45 = vcombine.low %v1319_v50, %v1322_v43  ;;  %v3641_v5 = vcombine.low %v5055_v27, %v5068_v9  ;;  %v1758_v41 = vshrl.u32 %v5077_v38, 16  ;;  %v1761_v40 = vshll.u32 %v5077_v38, 16 }
  0xe3   : > { %v1771_v28 = vshrl.u32 %v5080_v32, 16  ;;  %v3650_v12 = vcombine.low %v5077_v38, %v5080_v32  ;;  %v1566_v63 = vshrl.u32 %v5089_v60, 16  ;;  %v1569_v55 = vshll.u32 %v5089_v60, 16 }
  0xe4   : > { %v5100_v56 = vpop.permute.xlu1 %2107  ;;  %v1579_v58 = vshrl.u32 %v5098_v49, 16  ;;  %v2926_v52 = vsel %vm2924_vm13, %v2893_v24, %v4985_v14  ;;  %v2942_v37 = vsel %vm2924_vm13, %v2909_v42, %v4976_v15  ;;  %v1736_v4 = vrot.slane %v1734_v8, 4  ;;  %v5133_v15 = vld [vmem:[%s3961_s19 + $0x78] sm:$0xf] }
  0xe5   : > { %v2959_v31 = vsel %vm2957_vm14, %v2926_v52, 0  ;;  %v2967_v61 = vsel %vm2957_vm14, %v2942_v37, 0  ;;  %v1739_v59 = vrot.slane %v1737_v44, 5  ;;  %v3642_v14 = vcombine.low %v5089_v60, %v5098_v49 }
  0xe6   : > { %v5108_v51 = vpop.permute.xlu0 %2091  ;;  %2415 = vrot.lane.b32.xlu0 %v3626_v45, %s3913_s24  ;;  %2509 = vrot.lane.b32.xlu1 %v3649_v13, %s3914_s25  ;;  %v3551_v11 = vcombine.low %v5133_v15, %v5136_v48  ;;  %v1743_v1 = vshll.u32 %v5052_v10, 16  ;;  %v1749_v30 = vrot.slane %v1747_v19, 4  ;;  %v1753_v2 = vshll.u32 %v5117_v36, 16 }
  0xe7   : > { %3733 = vmatprep.mubr.msk.bf16.mxu0 %vm3002_vm15, %v2959_v31  ;;  %3749 = vmatprep.mubr.msk.bf16.mxu1 %vm3002_vm15, %v2967_v61  ;;  %v1740_v23 = vor.u32 %v1739_v59, %v1736_v4  ;;  %v1544_v21 = vrot.slane %v1542_v17, 4  ;;  %v1547_v47 = vrot.slane %v1545_v3, 5  ;;  %v1551_v42 = vshll.u32 %v5068_v9, 16 }
  0xe8   : > { %v5126_v34 = vpop.permute.xlu1 %2185  ;;  %v1745_v22 = vrot.slane %v1743_v1, 5  ;;  %v1557_v24 = vrot.slane %v1555_v16, 4  ;;  %v1561_v33 = vshll.u32 %v5124_v35, 16  ;;  %v1755_v50 = vrot.slane %v1753_v2, 5  ;;  %v5162_v16 = vld [vmem:[%s3961_s19 + $0xbc] sm:$0xf] }
  0xe9   : > { %v1741_v46 = vrot.slane %v1740_v23, 4  ;;  %v1548_v53 = vor.u32 %v1547_v47, %v1544_v21  ;;  %v1553_v44 = vrot.slane %v1551_v42, 5  ;;  %v3037_v19 = vsel %vm3035_vm0, %v3838_v20, 0  ;;  %v5186_v20 = vld [vmem:[%s3961_s19 + $0x5c] sm:$0xf] }
  0xea   : > { %v5145_v26 = vpop.permute.xlu0 %2169  ;;  %2493 = vrot.lane.b32.xlu0 %v3641_v5, %s3914_s25  ;;  %2511 = vrot.lane.b32.xlu1 %v3650_v12, %s3914_s25  ;;  %v1750_v8 = vor.u32 %v1749_v30, %v1745_v22  ;;  %v1563_v43 = vrot.slane %v1561_v33, 5  ;;  %v2944_v45 = vsel %vm2924_vm13, %v5065_v39, %v5034_v0  ;;  %v2928_v3 = vsel %vm2924_vm13, %v5072_v54, %v5057_v62 }
  0xeb   : > { %v1746_v13 = vsel %vm4069_vm5, %v1741_v46, %v1745_v22  ;;  %v1549_v17 = vrot.slane %v1548_v53, 4  ;;  %3732 = vmatpush3.bf16.msra.mxu0 %v3037_v19  ;;  %3770 = vmatpush3.bf16.msra.mxu1 %v3037_v19  ;;  %v1558_v52 = vor.u32 %v1557_v24, %v1553_v44  ;;  %v2968_v37 = vsel %vm2957_vm14, %v2944_v45, 0 }
  0xec   : > { %v5151_v57 = vpop.permute.xlu1 %2187  ;;  %v1751_v12 = vrot.slane %v1750_v8, 4  ;;  %v2960_v31 = vsel %vm2957_vm14, %v2928_v3, 0  ;;  %v1760_v39 = vrot.slane %v1758_v41, 4  ;;  %v1763_v62 = vrot.slane %v1761_v40, 5 }
  0xed   : > { %v1554_v0 = vsel %vm4069_vm5, %v1549_v17, %v1553_v44  ;;  %v1767_v54 = vshll.u32 %v5080_v32, 16  ;;  %v1559_v59 = vrot.slane %v1558_v52, 4  ;;  %v1777_v1 = vshll.u32 %v5162_v16, 16  ;;  %v3867_v44 = vld [vmem:[%s3961_s19 + $0x18] sm:$0xf] }
  0xee   : > { %v5164_v5 = vpop.permute.xlu0 %2171  ;;  %2495 = vrot.lane.b32.xlu0 %v3642_v14, %s3914_s25  ;;  %v1756_v4 = vsel %vm4069_vm5, %v1751_v12, %v1755_v50  ;;  %v1773_v14 = vrot.slane %v1771_v28, 4  ;;  %3734 = vmatmul.mubr.msk.bf16.vlgmr.msra.gmra.mrb[0].mxu0 %vm3002_vm15, %v2960_v31  ;;  %v1764_v30 = vor.u32 %v1763_v62, %v1760_v39  ;;  %v1568_v23 = vrot.slane %v1566_v63, 4  ;;  %v3869_v31 = vld [vmem:[%s3961_s19 + $0x84] sm:$0xf] }
  0xef   : > { %3750 = vmatmul.mubr.msk.bf16.vlgmr.msra.gmra.mrb[0].mxu1 %vm3002_vm15, %v2968_v37  ;;  %v3665_v41 = vcombine.low %v1746_v13, %v1756_v4  ;;  %v1769_v40 = vrot.slane %v1767_v54, 5  ;;  %v1564_v28 = vsel %vm4069_vm5, %v1559_v59, %v1563_v43  ;;  %v1779_v21 = vrot.slane %v1777_v1, 5  ;;  %v5225_v54 = vld [vmem:[%s3961_s19 + $0xa8] sm:$0xf]  ;;  %v5237_v1 = vld [vmem:[%s3961_s19 + $0xac] sm:$0xf] }
  0xf0   : > { %v5176_v61 = vpop.permute.xlu1 %2265  ;;  %v1571_v47 = vrot.slane %v1569_v55, 5  ;;  %v1575_v22 = vshll.u32 %v5098_v49, 16  ;;  %v3657_v42 = vcombine.low %v1554_v0, %v1564_v28  ;;  %v1765_v24 = vrot.slane %v1764_v30, 4  ;;  %v3868_v55 = vld [vmem:[%s3961_s19 + $0x1c] sm:$0xf] }
  0xf1   : > { %2589 = vrot.lane.b32.xlu1 %v3665_v41, %s3915_s26  ;;  %v1774_v33 = vor.u32 %v1773_v14, %v1769_v40  ;;  %v1581_v63 = vrot.slane %v1579_v58, 4  ;;  %v1585_v8 = vshll.u32 %v5186_v20, 16  ;;  %v3543_v43 = vcombine.low %v3867_v44, %v3868_v55  ;;  %v3870_v0 = vld [vmem:[%s3961_s19 + $0x88] sm:$0xf] }
  0xf2   : > { %v5190_v2 = vpop.permute.xlu0 %2249  ;;  %v1572_v50 = vor.u32 %v1571_v47, %v1568_v23  ;;  %v1577_v53 = vrot.slane %v1575_v22, 5  ;;  %2573 = vrot.lane.b32.xlu0 %v3657_v42, %s3915_s26  ;;  %v1770_v19 = vsel %vm4069_vm5, %v1765_v24, %v1769_v40  ;;  %v3537_v58 = vrot.slane %v5042_v6, 9  ;;  %v3871_v40 = vld [vmem:[%s3961_s19 + $0x24] sm:$0xf]  ;;  %v3872_v23 = vld [vmem:[%s3961_s19 + $0x28] sm:$0xf] }
  0xf3   : > { %v1775_v13 = vrot.slane %v1774_v33, 4  ;;  %v5216_v45 = vsel %vm2677_vm6, %v3551_v11, %v5005_v7  ;;  %v1587_v52 = vrot.slane %v1585_v8, 5  ;;  %v3552_v39 = vcombine.low %v3869_v31, %v3870_v0  ;;  %v5257_v42 = vld [vmem:[%s3961_s19 + $0x48] sm:$0xf]  ;;  %v5264_v8 = vld [vmem:[%s3961_s19 + $0x4c] sm:$0xf] }
  0xf4   : > { %v5200_v46 = vpop.permute.xlu1 %2267  ;;  %v1573_v3 = vrot.slane %v1572_v50, 4  ;;  %v1582_v12 = vor.u32 %v1581_v63, %v1577_v53  ;;  %v1963_v6 = vrot.slane %v5052_v10, 5  ;;  %v1966_v62 = vrot.slane %v5117_v36, 5 }
  0xf5   : > { %v1780_v37 = vsel %vm4069_vm5, %v1775_v13, %v1779_v21  ;;  %v3529_v4 = vrot.slane %v5055_v27, 9  ;;  %v1907_v36 = vrot.slane %v5068_v9, 5  ;;  %v1910_v14 = vrot.slane %v5124_v35, 5  ;;  %v5249_v9 = vld [vmem:[%s3961_s19 + $0xb0] sm:$0xf] }
  0xf6   : > { %v5209_v17 = vpop.permute.xlu0 %2251  ;;  %v3666_v15 = vcombine.low %v1770_v19, %v1780_v37  ;;  %v1578_v48 = vsel %vm4069_vm5, %v1573_v3, %v1577_v53  ;;  %v1583_v11 = vrot.slane %v1582_v12, 4  ;;  %v1964_v59 = vsel %vm4000_vm2, %v3537_v58, %v1963_v6  ;;  %v5276_v13 = vld [vmem:[%s3961_s19 + $0x50] sm:$0xf] }
  0xf7   : > { %v1965_v10 = vrot.slane %v1963_v6, 4  ;;  %v2686_v30 = vsel %vm2677_vm6, %v3543_v43, %v5013_v25  ;;  %v3544_v28 = vcombine.low %v3871_v40, %v3872_v23  ;;  %v587_v35 = vshrl.u32 %v5225_v54, 16 }
  0xf8   : > { %v5227_v7 = vpop.permute.xlu1 %2345  ;;  %2591 = vrot.lane.b32.xlu1 %v3666_v15, %s3915_s26  ;;  %v1588_v27 = vsel %vm4069_vm5, %v1583_v11, %v1587_v52  ;;  %v1908_v25 = vsel %vm4000_vm2, %v3529_v4, %v1907_v36  ;;  %v1909_v22 = vrot.slane %v1907_v36, 4  ;;  %v590_v50 = vshll.u32 %v5225_v54, 16 }
  0xf9   : > { %v3658_v21 = vcombine.low %v1578_v48, %v1588_v27  ;;  %v1967_v47 = vsel %vm4000_vm2, %v1965_v10, %v1966_v62  ;;  %v589_v63 = vrot.slane %v587_v35, 4  ;;  %v596_v53 = vshll.u32 %v5237_v1, 16 }
  0xfa   : > { %v5239_v41 = vpop.permute.xlu0 %2329  ;;  %v3681_v33 = vcombine.low %v1964_v59, %v1967_v47  ;;  %v5269_v44 = vsel %vm2677_vm6, %v3552_v39, %v5100_v56  ;;  %v1911_v55 = vsel %vm4000_vm2, %v1909_v22, %v1910_v14  ;;  %v600_v43 = vshrl.u32 %v5237_v1, 16 }
  0xfb   : > { %2575 = vrot.lane.b32.xlu0 %v3658_v21, %s3915_s26  ;;  %v606_v19 = vshll.u32 %v5249_v9, 16  ;;  %v3673_v58 = vcombine.low %v1908_v25, %v1911_v55  ;;  %v592_v3 = vrot.slane %v590_v50, 5  ;;  %v598_v12 = vrot.slane %v596_v53, 5 }
  0xfc   : > { %v5259_v24 = vpop.permute.xlu1 %2347  ;;  %2669 = vrot.lane.b32.xlu1 %v3681_v33, %s3916_s27  ;;  %v395_v52 = vshrl.u32 %v5257_v42, 16  ;;  %v5284_v56 = vsel %vm2677_vm6, %v3544_v28, %v5108_v51  ;;  %v602_v31 = vrot.slane %v600_v43, 4  ;;  %v398_v0 = vshll.u32 %v5257_v42, 16 }
  0xfd   : > { %v404_v39 = vshll.u32 %v5264_v8, 16  ;;  %v593_v62 = vor.u32 %v592_v3, %v589_v63  ;;  %v408_v48 = vshrl.u32 %v5264_v8, 16  ;;  %v414_v11 = vshll.u32 %v5276_v13, 16  ;;  %v5328_v3 = vld [vmem:[%s3961_s19 + $0xb8] sm:$0xf] }
  0xfe   : > { %v397_v15 = vrot.slane %v395_v52, 4  ;;  %v603_v4 = vor.u32 %v602_v31, %v598_v12  ;;  %v608_v59 = vrot.slane %v606_v19, 5  ;;  %v400_v10 = vrot.slane %v398_v0, 5 }
  0xff   : > { %v5280_v37 = vpop.permute.xlu0 %2331  ;;  %2653 = vrot.lane.b32.xlu0 %v3673_v58, %s3916_s27  ;;  %v406_v51 = vrot.slane %v404_v39, 5  ;;  %v5296_v36 = vsel %vm2726_vm7, %v5216_v45, %v5126_v34  ;;  %v5300_v14 = vsel %vm2726_vm7, %v2686_v30, %v5145_v26  ;;  %v594_v27 = vrot.slane %v593_v62, 4  ;;  %v5340_v62 = vld [vmem:[%s3961_s19 + $0xbc] sm:$0xf] }
 0x100   : > { %v5288_v6 = vpop.permute.xlu1 %2425  ;;  %v410_v40 = vrot.slane %v408_v48, 4  ;;  %v604_v28 = vrot.slane %v603_v4, 4  ;;  %v401_v35 = vor.u32 %v400_v10, %v397_v15  ;;  %v416_v21 = vrot.slane %v414_v11, 5 }
 0x101   : > { %v3538_v47 = vrot.slane %v5077_v38, 9  ;;  %v599_v34 = vsel %vm4069_vm5, %v594_v27, %v598_v12  ;;  %v1970_v22 = vrot.slane %v5080_v32, 5  ;;  %v1973_v26 = vrot.slane %v5162_v16, 5  ;;  %v5318_v32 = vld [vmem:[%s3961_s19 + $0xb4] sm:$0xf] }
 0x102   : > { %v411_v45 = vor.u32 %v410_v40, %v406_v51  ;;  %v609_v30 = vsel %vm4069_vm5, %v604_v28, %v608_v59  ;;  %v402_v33 = vrot.slane %v401_v35, 4  ;;  %v3530_v63 = vrot.slane %v5089_v60, 9  ;;  %v5349_v59 = vld [vmem:[%s3961_s19 + $0x58] sm:$0xf] }
 0x103   : > { %v5302_v23 = vpop.permute.xlu0 %2409  ;;  %v1914_v50 = vrot.slane %v5098_v49, 5  ;;  %v3571_v38 = vcombine.low %v599_v34, %v609_v30  ;;  %v1971_v55 = vsel %vm4000_vm2, %v3538_v47, %v1970_v22  ;;  %v1972_v43 = vrot.slane %v1970_v22, 4  ;;  %v5359_v47 = vld [vmem:[%s3961_s19 + $0x5c] sm:$0xf] }
 0x104   : > { %v5305_v25 = vpop.permute.xlu1 %2427  ;;  %v412_v53 = vrot.slane %v411_v45, 4  ;;  %v407_v16 = vsel %vm4069_vm5, %v402_v33, %v406_v51  ;;  %v1917_v58 = vrot.slane %v5186_v20, 5  ;;  %v788_v52 = vrot.slane %v5249_v9, 5  ;;  %v5343_v20 = vld [vmem:[%s3961_s19 + $0x54] sm:$0xf] }
 0x105   : > { %v1915_v60 = vsel %vm4000_vm2, %v3530_v63, %v1914_v50  ;;  %v1916_v49 = vrot.slane %v1914_v50, 4  ;;  %2113 = vrot.lane.b32.xlu1 %v3571_v38, %s3911_s22  ;;  %v732_v0 = vrot.slane %v5276_v13, 5  ;;  %v1974_v39 = vsel %vm4000_vm2, %v1972_v43, %v1973_v26 }
 0x106   : > { %v417_v31 = vsel %vm4069_vm5, %v412_v53, %v416_v21  ;;  %v3682_v48 = vcombine.low %v1971_v55, %v1974_v39  ;;  %v611_v4 = vshrl.u32 %v5318_v32, 16  ;;  %v614_v51 = vshll.u32 %v5318_v32, 16 }
 0x107   : > { %v5320_v19 = vpop.permute.xlu0 %2411  ;;  %v3563_v15 = vcombine.low %v407_v16, %v417_v31  ;;  %v1918_v11 = vsel %vm4000_vm2, %v1916_v49, %v1917_v58  ;;  %v620_v27 = vshll.u32 %v5328_v3, 16  ;;  %v624_v40 = vshrl.u32 %v5328_v3, 16 }
 0x108   : > { %v5330_v12 = vpop.permute.xlu1 %2505  ;;  %v3674_v10 = vcombine.low %v1915_v60, %v1918_v11  ;;  %v613_v35 = vrot.slane %v611_v4, 4  ;;  %v630_v21 = vshll.u32 %v5340_v62, 16  ;;  %v419_v34 = vshrl.u32 %v5343_v20, 16 }
 0x109   : > { %2097 = vrot.lane.b32.xlu0 %v3563_v15, %s3911_s22  ;;  %v422_v45 = vshll.u32 %v5343_v20, 16  ;;  %2671 = vrot.lane.b32.xlu1 %v3682_v48, %s3916_s27  ;;  %v616_v22 = vrot.slane %v614_v51, 5  ;;  %v622_v26 = vrot.slane %v620_v27, 5  ;;  %v626_v30 = vrot.slane %v624_v40, 4 }
 0x10a   : > { %v428_v33 = vshll.u32 %v5349_v59, 16  ;;  %v632_v50 = vrot.slane %v630_v21, 5  ;;  %v421_v38 = vrot.slane %v419_v34, 4  ;;  %v432_v55 = vshrl.u32 %v5349_v59, 16 }
 0x10b   : > { %v5354_v28 = vpop.permute.xlu0 %2489  ;;  %v424_v53 = vrot.slane %v422_v45, 5  ;;  %v617_v43 = vor.u32 %v616_v22, %v613_v35  ;;  %v627_v16 = vor.u32 %v626_v30, %v622_v26  ;;  %v438_v49 = vshll.u32 %v5359_v47, 16 }
 0x10c   : > { %v5365_v63 = vpop.permute.xlu1 %2507  ;;  %v430_v60 = vrot.slane %v428_v33, 5  ;;  %v2750_v31 = vsel %vm2726_vm7, %v5269_v44, %v5151_v57  ;;  %v2734_v39 = vsel %vm2726_vm7, %v5284_v56, %v5164_v5  ;;  %v434_v48 = vrot.slane %v432_v55, 4 }
 0x10d   : > { %2655 = vrot.lane.b32.xlu0 %v3674_v10, %s3916_s27  ;;  %v425_v15 = vor.u32 %v424_v53, %v421_v38  ;;  %v618_v11 = vrot.slane %v617_v43, 4  ;;  %v628_v4 = vrot.slane %v627_v16, 4  ;;  %v440_v51 = vrot.slane %v438_v49, 5  ;;  %v5427_v49 = vld [vmem:[%s3961_s19 + $0xb4] sm:$0xf] }
 0x10e   : > { %v3411_v27 = vrot.slane %v5225_v54, 9  ;;  %v435_v35 = vor.u32 %v434_v48, %v430_v60  ;;  %v785_v21 = vrot.slane %v5237_v1, 5  ;;  %v3403_v34 = vrot.slane %v5257_v42, 9  ;;  %v5446_v48 = vld [vmem:[%s3961_s19 + $0x54] sm:$0xf] }
 0x10f   : > { %v5369_v58 = vpop.permute.xlu0 %2491  ;;  %v426_v40 = vrot.slane %v425_v15, 4  ;;  %v2781_v57 = vsel %vm2759_vm8, %v5296_v36, %v5176_v61  ;;  %v623_v5 = vsel %vm4069_vm5, %v618_v11, %v622_v26  ;;  %v633_v44 = vsel %vm4069_vm5, %v628_v4, %v632_v50  ;;  %v5449_v11 = vld [vmem:[%s3961_s19 + $0x58] sm:$0xf] }
 0x110   : > { %v729_v56 = vrot.slane %v5264_v8, 5  ;;  %v5389_v10 = vpop.permute.xlu1 %2585  ;;  %v2765_v54 = vsel %vm2759_vm8, %v5300_v14, %v5190_v2  ;;  %v3572_v1 = vcombine.low %v623_v5, %v633_v44  ;;  %v436_v45 = vrot.slane %v435_v35, 4 }
 0x111   : > { %v431_v42 = vsel %vm4069_vm5, %v426_v40, %v430_v60  ;;  %v786_v61 = vsel %vm4000_vm2, %v3411_v27, %v785_v21  ;;  %v787_v36 = vrot.slane %v785_v21, 4  ;;  %v3412_v14 = vrot.slane %v5318_v32, 9  ;;  %v5458_v27 = vld [vmem:[%s3961_s19 + $0xc0] sm:$0xf] }
 0x112   : > { %v730_v22 = vsel %vm4000_vm2, %v3403_v34, %v729_v56  ;;  %v731_v26 = vrot.slane %v729_v56, 4  ;;  %2115 = vrot.lane.b32.xlu1 %v3572_v1, %s3911_s22  ;;  %v441_v2 = vsel %vm4069_vm5, %v436_v45, %v440_v51  ;;  %v792_v30 = vrot.slane %v5328_v3, 5 }
 0x113   : > { %v5400_v8 = vpop.permute.xlu0 %2569  ;;  %v795_v33 = vrot.slane %v5340_v62, 5  ;;  %v3564_v50 = vcombine.low %v431_v42, %v441_v2  ;;  %v789_v38 = vsel %vm4000_vm2, %v787_v36, %v788_v52  ;;  %v3404_v55 = vrot.slane %v5343_v20, 9  ;;  %v5491_v36 = vld [vmem:[%s3961_s19 + $0xbc] sm:$0xf] }
 0x114   : > { %v733_v53 = vsel %vm4000_vm2, %v731_v26, %v732_v0  ;;  %v2783_v43 = vsel %vm2759_vm8, %v2750_v31, %v5200_v46  ;;  %v3587_v16 = vcombine.low %v786_v61, %v789_v38  ;;  %v793_v62 = vsel %vm4000_vm2, %v3412_v14, %v792_v30  ;;  %v5430_v46 = vld [vmem:[%s3961_s19 + $0xb8] sm:$0xf]  ;;  %v5432_v31 = vpop.permute.xlu1 %2587 }
 0x115   : > { %v794_v9 = vrot.slane %v792_v30, 4  ;;  %2099 = vrot.lane.b32.xlu0 %v3564_v50, %s3911_s22  ;;  %v2767_v13 = vsel %vm2759_vm8, %v2734_v39, %v5209_v17  ;;  %v3579_v52 = vcombine.low %v730_v22, %v733_v53  ;;  %v736_v0 = vrot.slane %v5349_v59, 5  ;;  %v5499_v30 = vld [vmem:[%s3961_s19 + $0x64] sm:$0xf]  ;;  %v5506_v53 = vld [vmem:[%s3961_s19 + $0x5c] sm:$0xf] }
 0x116   : > { %v739_v60 = vrot.slane %v5359_v47, 5  ;;  %2193 = vrot.lane.b32.xlu1 %v3587_v16, %s3910_s21  ;;  %v2814_v15 = vsel %vm2792_vm9, %v2781_v57, %v5227_v7  ;;  %v2798_v17 = vsel %vm2792_vm9, %v2765_v54, %v5239_v41  ;;  %v5443_v47 = vsel %vm2792_vm9, %v2783_v43, %v5259_v24  ;;  %v5468_v57 = vld [vmem:[%s3961_s19 + $0xc4] sm:$0xf]  ;;  %v5477_v54 = vld [vmem:[%s3961_s19 + $0x60] sm:$0xf] }
 0x117   : > { %v796_v39 = vsel %vm4000_vm2, %v794_v9, %v795_v33  ;;  %v737_v7 = vsel %vm4000_vm2, %v3404_v55, %v736_v0  ;;  %v738_v51 = vrot.slane %v736_v0, 4  ;;  %v5455_v41 = vsel %vm2792_vm9, %v2767_v13, %v5280_v37 }
 0x118   : > { %v3588_v4 = vcombine.low %v793_v62, %v796_v39  ;;  %v5460_v40 = vpop.permute.xlu0 %2571  ;;  %v1186_v24 = vshrl.u32 %v5427_v49, 16  ;;  %v1189_v35 = vshll.u32 %v5427_v49, 16  ;;  %v1199_v21 = vshrl.u32 %v5430_v46, 16  ;;  %v5501_v33 = vpop.permute.xlu1 %2665 }
 0x119   : > { %v3603_v34 = vcombine.low %v5427_v49, %v5430_v46  ;;  %2177 = vrot.lane.b32.xlu0 %v3579_v52, %s3910_s21  ;;  %v740_v37 = vsel %vm4000_vm2, %v738_v51, %v739_v60  ;;  %v994_v5 = vshrl.u32 %v5446_v48, 16  ;;  %v997_v44 = vshll.u32 %v5446_v48, 16 }
 0x11a   : > { %v1007_v56 = vshrl.u32 %v5449_v11, 16  ;;  %2195 = vrot.lane.b32.xlu1 %v3588_v4, %s3910_s21  ;;  %v3580_v1 = vcombine.low %v737_v7, %v740_v37  ;;  %v3595_v42 = vcombine.low %v5446_v48, %v5449_v11  ;;  %v5484_v45 = vsel %vm2825_vm10, %v2814_v15, %v5288_v6 }
 0x11b   : > { %v5488_v61 = vsel %vm2825_vm10, %v2798_v17, %v5302_v23  ;;  %v1210_v22 = vshrl.u32 %v5458_v27, 16  ;;  %v1213_v26 = vshll.u32 %v5458_v27, 16  ;;  %v1223_v2 = vshrl.u32 %v5468_v57, 16 }
 0x11c   : > { %v3604_v14 = vcombine.low %v5458_v27, %v5468_v57  ;;  %v1018_v6 = vshrl.u32 %v5477_v54, 16  ;;  %v1021_v23 = vshll.u32 %v5477_v54, 16  ;;  %v1188_v50 = vrot.slane %v1186_v24, 4  ;;  %v5511_v9 = vpop.permute.xlu0 %2649 }
 0x11d   : > { %v1191_v38 = vrot.slane %v1189_v35, 5  ;;  %2179 = vrot.lane.b32.xlu0 %v3580_v1, %s3910_s21  ;;  %v1195_v55 = vshll.u32 %v5430_v46, 16  ;;  %v1201_v43 = vrot.slane %v1199_v21, 4  ;;  %v1205_v16 = vshll.u32 %v5491_v36, 16  ;;  %v5520_v21 = vld [vmem:[%s3961_s19 + $0xc8] sm:$0xf] }
 0x11e   : > { %v996_v62 = vrot.slane %v994_v5, 4  ;;  %2273 = vrot.lane.b32.xlu1 %v3603_v34, %s3909_s20  ;;  %v999_v52 = vrot.slane %v997_v44, 5  ;;  %v1003_v0 = vshll.u32 %v5449_v11, 16  ;;  %v1009_v60 = vrot.slane %v1007_v56, 4 }
 0x11f   : > { %v1192_v13 = vor.u32 %v1191_v38, %v1188_v50  ;;  %v1031_v15 = vshrl.u32 %v5499_v30, 16  ;;  %v3596_v17 = vcombine.low %v5477_v54, %v5499_v30  ;;  %v1197_v39 = vrot.slane %v1195_v55, 5 }
 0x120   : > { %v1013_v4 = vshll.u32 %v5506_v53, 16  ;;  %v1207_v51 = vrot.slane %v1205_v16, 5  ;;  %v1000_v24 = vor.u32 %v999_v52, %v996_v62  ;;  %v1005_v35 = vrot.slane %v1003_v0, 5  ;;  %v5523_v56 = vpop.permute.xlu1 %2109 }
 0x121   : > { %v1193_v7 = vrot.slane %v1192_v13, 4  ;;  %2257 = vrot.lane.b32.xlu0 %v3595_v42, %s3909_s20  ;;  %v1202_v34 = vor.u32 %v1201_v43, %v1197_v39  ;;  %v1212_v5 = vrot.slane %v1210_v22, 4  ;;  %v1215_v44 = vrot.slane %v1213_v26, 5 }
 0x122   : > { %v1015_v37 = vrot.slane %v1013_v4, 5  ;;  %2275 = vrot.lane.b32.xlu1 %v3604_v14, %s3909_s20  ;;  %v1001_v50 = vrot.slane %v1000_v24, 4  ;;  %v1010_v38 = vor.u32 %v1009_v60, %v1005_v35  ;;  %v1219_v55 = vshll.u32 %v5468_v57, 16  ;;  %v5538_v4 = vld [vmem:[%s3961_s19 + $0x68] sm:$0xf] }
 0x123   : > { %v1198_v1 = vsel %vm4069_vm5, %v1193_v7, %v1197_v39  ;;  %v1203_v16 = vrot.slane %v1202_v34, 4  ;;  %v1216_v62 = vor.u32 %v1215_v44, %v1212_v5  ;;  %v1225_v13 = vrot.slane %v1223_v2, 4 }
 0x124   : > { %v1229_v42 = vshll.u32 %v5520_v21, 16  ;;  %v5530_v43 = vpop.permute.xlu0 %2093  ;;  %v1006_v22 = vsel %vm4069_vm5, %v1001_v50, %v1005_v35  ;;  %v1011_v26 = vrot.slane %v1010_v38, 4  ;;  %v1221_v14 = vrot.slane %v1219_v55, 5 }
 0x125   : > { %v1020_v52 = vrot.slane %v1018_v6, 4  ;;  %2259 = vrot.lane.b32.xlu0 %v3596_v17, %s3909_s20  ;;  %v1208_v0 = vsel %vm4069_vm5, %v1203_v16, %v1207_v51  ;;  %v1217_v60 = vrot.slane %v1216_v62, 4  ;;  %v1023_v2 = vrot.slane %v1021_v23, 5  ;;  %v5546_v51 = vpop.permute.xlu1 %2667 }
 0x126   : > { %v1231_v39 = vrot.slane %v1229_v42, 5  ;;  %v3619_v7 = vcombine.low %v1198_v1, %v1208_v0  ;;  %v1016_v24 = vsel %vm4069_vm5, %v1011_v26, %v1015_v37  ;;  %v1226_v34 = vor.u32 %v1225_v13, %v1221_v14 }
 0x127   : > { %v1027_v35 = vshll.u32 %v5499_v30, 16  ;;  %v2849_v6 = vsel %vm2825_vm10, %v5443_v47, %v5305_v25  ;;  %v3611_v17 = vcombine.low %v1006_v22, %v1016_v24  ;;  %v1024_v5 = vor.u32 %v1023_v2, %v1020_v52 }
 0x128   : > { %v1033_v44 = vrot.slane %v1031_v15, 4  ;;  %2353 = vrot.lane.b32.xlu1 %v3619_v7, %s3912_s23  ;;  %v1222_v23 = vsel %vm4069_vm5, %v1217_v60, %v1221_v14  ;;  %v1227_v1 = vrot.slane %v1226_v34, 4  ;;  %v1037_v37 = vshll.u32 %v5538_v4, 16  ;;  %v5558_v55 = vpop.permute.xlu0 %2651 }
 0x129   : > { %v1029_v50 = vrot.slane %v1027_v35, 5  ;;  %v2833_v38 = vsel %vm2825_vm10, %v5455_v41, %v5320_v19  ;;  %2337 = vrot.lane.b32.xlu0 %v3611_v17, %s3912_s23  ;;  %v1025_v25 = vrot.slane %v1024_v5, 4  ;;  %v3475_v47 = vrot.slane %v5427_v49, 9  ;;  %v5598_v5 = vld [vmem:[%s3961_s19 + $0xc0] sm:$0xf] }
 0x12a   : > { %v1381_v15 = vrot.slane %v5430_v46, 5  ;;  %v1232_v16 = vsel %vm4069_vm5, %v1227_v1, %v1231_v39  ;;  %v1039_v13 = vrot.slane %v1037_v37, 5  ;;  %v1384_v42 = vrot.slane %v5491_v36, 5 }
 0x12b   : > { %v1034_v62 = vor.u32 %v1033_v44, %v1029_v50  ;;  %v3620_v22 = vcombine.low %v1222_v23, %v1232_v16  ;;  %v1030_v19 = vsel %vm4069_vm5, %v1025_v25, %v1029_v50  ;;  %v3467_v46 = vrot.slane %v5446_v48, 9  ;;  %v5636_v16 = vld [vmem:[%s3961_s19 + $0x64] sm:$0xf] }
 0x12c   : > { %v1382_v41 = vsel %vm4000_vm2, %v3475_v47, %v1381_v15  ;;  %v1383_v26 = vrot.slane %v1381_v15, 4  ;;  %v1325_v14 = vrot.slane %v5449_v11, 5  ;;  %v1328_v52 = vrot.slane %v5506_v53, 5 }
 0x12d   : > { %v1035_v49 = vrot.slane %v1034_v62, 4  ;;  %v2880_v0 = vsel %vm2858_vm11, %v5484_v45, %v5330_v12  ;;  %v2864_v36 = vsel %vm2858_vm11, %v5488_v61, %v5354_v28  ;;  %2355 = vrot.lane.b32.xlu1 %v3620_v22, %s3912_s23  ;;  %v3476_v48 = vrot.slane %v5458_v27, 9 }
 0x12e   : > { %v1385_v60 = vsel %vm4000_vm2, %v1383_v26, %v1384_v42  ;;  %v1326_v12 = vsel %vm4000_vm2, %v3467_v46, %v1325_v14  ;;  %v1327_v45 = vrot.slane %v1325_v14, 4  ;;  %v1388_v28 = vrot.slane %v5468_v57, 5 }
 0x12f   : > { %v1040_v11 = vsel %vm4069_vm5, %v1035_v49, %v1039_v13  ;;  %v3635_v53 = vcombine.low %v1382_v41, %v1385_v60  ;;  %v1391_v61 = vrot.slane %v5520_v21, 5  ;;  %v3468_v7 = vrot.slane %v5477_v54, 9  ;;  %v5652_v41 = vld [vmem:[%s3961_s19 + $0x6c] sm:$0xf] }
 0x130   : > { %v5580_v39 = vpop.permute.xlu1 %2111  ;;  %v3612_v2 = vcombine.low %v1030_v19, %v1040_v11  ;;  %v2882_v27 = vsel %vm2858_vm11, %v2849_v6, %v5365_v63  ;;  %v1329_v34 = vsel %vm4000_vm2, %v1327_v45, %v1328_v52  ;;  %v1332_v35 = vrot.slane %v5499_v30, 5  ;;  %v5607_v6 = vld [vmem:[%s3961_s19 + $0xc4] sm:$0xf]  ;;  %v5649_v19 = vld [vmem:[%s3961_s19 + $0xd0] sm:$0xf] }
 0x131   : > { %v1335_v17 = vrot.slane %v5538_v4, 5  ;;  %v2866_v57 = vsel %vm2858_vm11, %v2833_v38, %v5369_v58  ;;  %2433 = vrot.lane.b32.xlu1 %v3635_v53, %s3913_s24  ;;  %v3627_v54 = vcombine.low %v1326_v12, %v1329_v34  ;;  %v1389_v63 = vsel %vm4000_vm2, %v3476_v48, %v1388_v28  ;;  %v5627_v38 = vld [vmem:[%s3961_s19 + $0x60] sm:$0xf]  ;;  %v5660_v52 = vld [vmem:[%s3961_s19 + $0x70] sm:$0xf] }
 0x132   : > { %v5589_v24 = vpop.permute.xlu0 %2095  ;;  %2339 = vrot.lane.b32.xlu0 %v3612_v2, %s3912_s23  ;;  %v1390_v21 = vrot.slane %v1388_v28, 4  ;;  %v2913_v4 = vsel %vm2891_vm12, %v2880_v0, %v5389_v10  ;;  %v2897_v44 = vsel %vm2891_vm12, %v2864_v36, %v5400_v8  ;;  %v1333_v58 = vsel %vm4000_vm2, %v3468_v7, %v1332_v35  ;;  %v5672_v48 = vld [vmem:[%s3961_s19 + $0xc8] sm:$0xf] }
 0x133   : > { %v1334_v23 = vrot.slane %v1332_v35, 4  ;;  %v2915_v50 = vsel %vm2891_vm12, %v2882_v27, %v5432_v31  ;;  %v5623_v37 = vsel %vm2891_vm12, %v2866_v57, %v5460_v40  ;;  %v1782_v10 = vshrl.u32 %v5598_v5, 16  ;;  %v5639_v40 = vld [vmem:[%s3961_s19 + $0xcc] sm:$0xf]  ;;  %v5684_v34 = vld [vmem:[%s3961_s19 + $0x68] sm:$0xf] }
 0x134   : > { %v5609_v30 = vpop.permute.xlu1 %2189  ;;  %v1392_v1 = vsel %vm4000_vm2, %v1390_v21, %v1391_v61  ;;  %v1785_v15 = vshll.u32 %v5598_v5, 16  ;;  %v1795_v31 = vshrl.u32 %v5607_v6, 16  ;;  %v3651_v13 = vcombine.low %v5598_v5, %v5607_v6 }
 0x135   : > { %v3636_v25 = vcombine.low %v1389_v63, %v1392_v1  ;;  %v1336_v47 = vsel %vm4000_vm2, %v1334_v23, %v1335_v17  ;;  %v2946_v42 = vsel %vm2924_vm13, %v2913_v4, %v5501_v33  ;;  %v2930_v22 = vsel %vm2924_vm13, %v2897_v44, %v5511_v9 }
 0x136   : > { %v5629_v8 = vpop.permute.xlu0 %2173  ;;  %2417 = vrot.lane.b32.xlu0 %v3627_v54, %s3913_s24  ;;  %v3628_v62 = vcombine.low %v1333_v58, %v1336_v47  ;;  %v1590_v26 = vshrl.u32 %v5627_v38, 16  ;;  %v1593_v49 = vshll.u32 %v5627_v38, 16  ;;  %v2969_v46 = vsel %vm2957_vm14, %v2946_v42, 0 }
 0x137   : > { %2435 = vrot.lane.b32.xlu1 %v3636_v25, %s3913_s24  ;;  %v2961_v14 = vsel %vm2957_vm14, %v2930_v22, 0  ;;  %v1603_v9 = vshrl.u32 %v5636_v16, 16  ;;  %v3643_v0 = vcombine.low %v5627_v38, %v5636_v16  ;;  %v1806_v36 = vshrl.u32 %v5639_v40, 16  ;;  %3753 = vmatprep.mubr.msk.bf16.mxu1 %vm3002_vm15, %v2969_v46 }
 0x138   : > { %v1809_v60 = vshll.u32 %v5639_v40, 16  ;;  %3737 = vmatprep.mubr.msk.bf16.mxu0 %vm3002_vm15, %v2961_v14  ;;  %v1819_v53 = vshrl.u32 %v5649_v19, 16  ;;  %v3652_v12 = vcombine.low %v5639_v40, %v5649_v19  ;;  %v1614_v45 = vshrl.u32 %v5652_v41, 16 }
 0x139   : > { %v5662_v33 = vpop.permute.xlu1 %2191  ;;  %v1617_v2 = vshll.u32 %v5652_v41, 16  ;;  %v1784_v28 = vrot.slane %v1782_v10, 4  ;;  %v1787_v61 = vrot.slane %v1785_v15, 5  ;;  %v1791_v7 = vshll.u32 %v5607_v6, 16 }
 0x13a   : > { %v5674_v11 = vpop.permute.xlu0 %2175  ;;  %2419 = vrot.lane.b32.xlu0 %v3628_v62, %s3913_s24  ;;  %v1797_v27 = vrot.slane %v1795_v31, 4  ;;  %v1627_v35 = vshrl.u32 %v5660_v52, 16  ;;  %v3644_v17 = vcombine.low %v5652_v41, %v5660_v52  ;;  %v1801_v57 = vshll.u32 %v5672_v48, 16 }
 0x13b   : > { %2513 = vrot.lane.b32.xlu1 %v3651_v13, %s3914_s25  ;;  %v1592_v54 = vrot.slane %v1590_v26, 4  ;;  %v1788_v21 = vor.u32 %v1787_v61, %v1784_v28  ;;  %v1793_v4 = vrot.slane %v1791_v7, 5  ;;  %v1595_v44 = vrot.slane %v1593_v49, 5  ;;  %v5706_v49 = vld [vmem:[%s3961_s19 + $0xd4] sm:$0xf] }
 0x13c   : > { %v1599_v58 = vshll.u32 %v5636_v16, 16  ;;  %v1803_v23 = vrot.slane %v1801_v57, 5  ;;  %v1605_v1 = vrot.slane %v1603_v9, 4  ;;  %v1609_v10 = vshll.u32 %v5684_v34, 16 }
 0x13d   : > { %v5691_v63 = vpop.permute.xlu1 %2269  ;;  %v2948_v25 = vsel %vm2924_vm13, %v2915_v50, %v5546_v51  ;;  %v1789_v15 = vrot.slane %v1788_v21, 4  ;;  %v1798_v31 = vor.u32 %v1797_v27, %v1793_v4  ;;  %v1596_v62 = vor.u32 %v1595_v44, %v1592_v54 }
 0x13e   : > { %v5697_v47 = vpop.permute.xlu0 %2253  ;;  %2497 = vrot.lane.b32.xlu0 %v3643_v0, %s3914_s25  ;;  %v1601_v13 = vrot.slane %v1599_v58, 5  ;;  %v1611_v42 = vrot.slane %v1609_v10, 5  ;;  %v2970_v22 = vsel %vm2957_vm14, %v2948_v25, 0  ;;  %v2932_v26 = vsel %vm2924_vm13, %v5623_v37, %v5558_v55 }
 0x13f   : > { %2515 = vrot.lane.b32.xlu1 %v3652_v12, %s3914_s25  ;;  %v1808_v51 = vrot.slane %v1806_v36, 4  ;;  %v1794_v46 = vsel %vm4069_vm5, %v1789_v15, %v1793_v4  ;;  %v1799_v14 = vrot.slane %v1798_v31, 4  ;;  %v1597_v9 = vrot.slane %v1596_v62, 4  ;;  %3754 = vmatmul.mubr.msk.bf16.gmra.mrb[4].mxu1 %vm3002_vm15, %v2970_v22 }
 0x140   : > { %v1606_v0 = vor.u32 %v1605_v1, %v1601_v13  ;;  %v2962_v12 = vsel %vm2957_vm14, %v2932_v26, 0  ;;  %v1811_v28 = vrot.slane %v1809_v60, 5  ;;  %v1815_v61 = vshll.u32 %v5649_v19, 16  ;;  %v5723_v60 = vld [vmem:[%s3961_s19 + $0x74] sm:$0xf] }
 0x141   : > { %v5708_v50 = vpop.permute.xlu1 %2271  ;;  %v1821_v55 = vrot.slane %v1819_v53, 4  ;;  %v1804_v37 = vsel %vm4069_vm5, %v1799_v14, %v1803_v23  ;;  %v1602_v36 = vsel %vm4069_vm5, %v1597_v9, %v1601_v13  ;;  %v1825_v27 = vshll.u32 %v5706_v49, 16  ;;  %3738 = vmatmul.mubr.msk.bf16.gmra.mrb[4].mxu0 %vm3002_vm15, %v2962_v12 }
 0x142   : > { %2499 = vrot.lane.b32.xlu0 %v3644_v17, %s3914_s25  ;;  %v1607_v7 = vrot.slane %v1606_v0, 4  ;;  %v3667_v57 = vcombine.low %v1794_v46, %v1804_v37  ;;  %v1812_v54 = vor.u32 %v1811_v28, %v1808_v51  ;;  %v1817_v21 = vrot.slane %v1815_v61, 5  ;;  %v5725_v53 = vpop.permute.xlu0 %2255 }
 0x143   : > { %v1616_v4 = vrot.slane %v1614_v45, 4  ;;  %v1827_v44 = vrot.slane %v1825_v27, 5  ;;  %v1619_v58 = vrot.slane %v1617_v2, 5  ;;  %v1623_v23 = vshll.u32 %v5660_v52, 16 }
 0x144   : > { %v1612_v17 = vsel %vm4069_vm5, %v1607_v7, %v1611_v42  ;;  %2593 = vrot.lane.b32.xlu1 %v3667_v57, %s3915_s26  ;;  %v1813_v10 = vrot.slane %v1812_v54, 4  ;;  %v1822_v25 = vor.u32 %v1821_v55, %v1817_v21  ;;  %v1629_v15 = vrot.slane %v1627_v35, 4 }
 0x145   : > { %v3659_v1 = vcombine.low %v1602_v36, %v1612_v17  ;;  %v1620_v62 = vor.u32 %v1619_v58, %v1616_v4  ;;  %v1625_v13 = vrot.slane %v1623_v23, 5  ;;  %v1633_v45 = vshll.u32 %v5723_v60, 16 }
 0x146   : > { %v5731_v31 = vpop.permute.xlu1 %2349  ;;  %v1818_v42 = vsel %vm4069_vm5, %v1813_v10, %v1817_v21  ;;  %v1823_v2 = vrot.slane %v1822_v25, 4  ;;  %v3539_v22 = vrot.slane %v5598_v5, 9  ;;  %v1977_v14 = vrot.slane %v5607_v6, 5 }
 0x147   : > { %2577 = vrot.lane.b32.xlu0 %v3659_v1, %s3915_s26  ;;  %v1621_v26 = vrot.slane %v1620_v62, 4  ;;  %v1630_v51 = vor.u32 %v1629_v15, %v1625_v13  ;;  %v1635_v46 = vrot.slane %v1633_v45, 5  ;;  %v1980_v9 = vrot.slane %v5672_v48, 5  ;;  %v5742_v0 = vpop.permute.xlu0 %2333 }
 0x148   : > { %v1828_v35 = vsel %vm4069_vm5, %v1823_v2, %v1827_v44  ;;  %v3531_v55 = vrot.slane %v5627_v38, 9  ;;  %v1978_v5 = vsel %vm4000_vm2, %v3539_v22, %v1977_v14  ;;  %v1979_v37 = vrot.slane %v1977_v14, 4 }
 0x149   : > { %v3668_v12 = vcombine.low %v1818_v42, %v1828_v35  ;;  %v1626_v28 = vsel %vm4069_vm5, %v1621_v26, %v1625_v13  ;;  %v1631_v61 = vrot.slane %v1630_v51, 4  ;;  %v1921_v36 = vrot.slane %v5636_v16, 5  ;;  %v3873_v51 = vld [vmem:[%s3961_s19 + $0x90] sm:$0xf] }
 0x14a   : > { %v1924_v7 = vrot.slane %v5684_v34, 5  ;;  %v3540_v27 = vrot.slane %v5639_v40, 9  ;;  %v1981_v38 = vsel %vm4000_vm2, %v1979_v37, %v1980_v9  ;;  %v1984_v34 = vrot.slane %v5649_v19, 5  ;;  %v3876_v9 = vld [vmem:[%s3961_s19 + $0x34] sm:$0xf] }
 0x14b   : > { %2595 = vrot.lane.b32.xlu1 %v3668_v12, %s3915_s26  ;;  %v1636_v48 = vsel %vm4069_vm5, %v1631_v61, %v1635_v46  ;;  %v1922_v54 = vsel %vm4000_vm2, %v3531_v55, %v1921_v36  ;;  %v1923_v21 = vrot.slane %v1921_v36, 4  ;;  %v3683_v16 = vcombine.low %v1978_v5, %v1981_v38  ;;  %v3874_v46 = vld [vmem:[%s3961_s19 + $0x94] sm:$0xf] }
 0x14c   : > { %v5751_v6 = vpop.permute.xlu1 %2351  ;;  %v3660_v57 = vcombine.low %v1626_v28, %v1636_v48  ;;  %v1987_v4 = vrot.slane %v5706_v49, 5  ;;  %v3532_v17 = vrot.slane %v5652_v41, 9  ;;  %v1928_v40 = vrot.slane %v5660_v52, 5 }
 0x14d   : > { %v1925_v29 = vsel %vm4000_vm2, %v1923_v21, %v1924_v7  ;;  %v1931_v44 = vrot.slane %v5723_v60, 5  ;;  %v1985_v19 = vsel %vm4000_vm2, %v3540_v27, %v1984_v34  ;;  %v1986_v49 = vrot.slane %v1984_v34, 4  ;;  %v3877_v34 = vld [vmem:[%s3961_s19 + $0x9c] sm:$0xf] }
 0x14e   : > { %2579 = vrot.lane.b32.xlu0 %v3660_v57, %s3915_s26  ;;  %v3675_v1 = vcombine.low %v1922_v54, %v1925_v29  ;;  %v1929_v41 = vsel %vm4000_vm2, %v3532_v17, %v1928_v40  ;;  %v1930_v10 = vrot.slane %v1928_v40, 4  ;;  %v3553_v35 = vcombine.low %v3873_v51, %v3874_v46  ;;  %v3879_v40 = vld [vmem:[%s3961_s19 + $0x3c] sm:$0xf] }
 0x14f   : > { %2673 = vrot.lane.b32.xlu1 %v3683_v16, %s3916_s27  ;;  %v1988_v52 = vsel %vm4000_vm2, %v1986_v49, %v1987_v4  ;;  %v3545_v12 = vcombine.low %v3875_v18, %v3876_v9 }
 0x150   : > { %v5769_v58 = vpop.permute.xlu0 %2335  ;;  %v2430_v23 = vpop.permute.xlu1 %2429  ;;  %v3684_v60 = vcombine.low %v1985_v19, %v1988_v52  ;;  %v1932_v25 = vsel %vm4000_vm2, %v1930_v10, %v1931_v44  ;;  %v2716_v61 = vsel %vm2677_vm6, %v3553_v35, %v5523_v56  ;;  %v3880_v44 = vld [vmem:[%s3961_s19 + $0x40] sm:$0xf] }
 0x151   : > { %v3676_v13 = vcombine.low %v1929_v41, %v1932_v25  ;;  %v2752_v55 = vsel %vm2726_vm7, %v2716_v61, %v5609_v30  ;;  %v2692_v36 = vsel %vm2677_vm6, %v3545_v12, %v5530_v43 }
 0x152   : > { %2657 = vrot.lane.b32.xlu0 %v3675_v1, %s3916_s27  ;;  %v2785_v5 = vsel %vm2759_vm8, %v2752_v55, %v5691_v63  ;;  %v2736_v48 = vsel %vm2726_vm7, %v2692_v36, %v5629_v8 }
 0x153   : > { %2675 = vrot.lane.b32.xlu1 %v3684_v60, %s3916_s27  ;;  %v2818_v7 = vsel %vm2792_vm9, %v2785_v5, %v5731_v31  ;;  %v2769_v30 = vsel %vm2759_vm8, %v2736_v48, %v5697_v47 }
 0x154   : > { %v2414_v15 = vpop.permute.xlu0 %2413  ;;  %v2432_v62 = vpop.permute.xlu1 %2431  ;;  %v2851_v56 = vsel %vm2825_vm10, %v2818_v7, %v2430_v23  ;;  %v2802_v57 = vsel %vm2792_vm9, %v2769_v30, %v5742_v0  ;;  %v3878_v0 = vld [vmem:[%s3961_s19 + $0xa0] sm:$0xf]  ;;  %v3546_v23 = vcombine.low %v3879_v40, %v3880_v44 }
 0x155   : > { %v2835_v38 = vsel %vm2825_vm10, %v2802_v57, %v2414_v15  ;;  %v3554_v4 = vcombine.low %v3877_v34, %v3878_v0  ;;  %v3556_v0 = vcombine.low %v5318_v32, %v5328_v3 }
 0x156   : > { %2659 = vrot.lane.b32.xlu0 %v3676_v13, %s3916_s27  ;;  %v2695_v10 = vsel %vm2677_vm6, %v3546_v23, %v5589_v24 }
 0x157   : > { %v2719_v1 = vsel %vm2677_vm6, %v3554_v4, %v5580_v39  ;;  %v2738_v60 = vsel %vm2726_vm7, %v2695_v10, %v5674_v11  ;;  %v3548_v4 = vcombine.low %v5343_v20, %v5349_v59 }
 0x158   : > { %v2416_v45 = vpop.permute.xlu0 %2415  ;;  %v2510_v42 = vpop.permute.xlu1 %2509  ;;  %v2754_v19 = vsel %vm2726_vm7, %v2719_v1, %v5662_v33  ;;  %v2771_v39 = vsel %vm2759_vm8, %v2738_v60, %v5725_v53  ;;  %v5873_v60 = vld [vmem:[%s5950_s2] ss:$0 sm:$0xff] }
 0x159   : > { %v2884_v27 = vsel %vm2858_vm11, %v2851_v56, %v2510_v42  ;;  %v2787_v49 = vsel %vm2759_vm8, %v2754_v19, %v5708_v50  ;;  %v2804_v50 = vsel %vm2792_vm9, %v2771_v39, %v5769_v58 }
 0x15a   : > { %v2820_v52 = vsel %vm2792_vm9, %v2787_v49, %v5751_v6  ;;  %v2837_v42 = vsel %vm2825_vm10, %v2804_v50, %v2416_v45 }
 0x15b   : > { %v2853_v25 = vsel %vm2825_vm10, %v2820_v52, %v2432_v62 }
 0x15c   : > { %v2494_v2 = vpop.permute.xlu0 %2493  ;;  %v2512_v22 = vpop.permute.xlu1 %2511 }
 0x15d   : > { %v2868_v54 = vsel %vm2858_vm11, %v2835_v38, %v2494_v2  ;;  %v2886_v33 = vsel %vm2858_vm11, %v2853_v25, %v2512_v22 }
 0x160   : > { %v2496_v26 = vpop.permute.xlu0 %2495 }
 0x161   : > { %v2870_v11 = vsel %vm2858_vm11, %v2837_v42, %v2496_v26 }
 0x163   : > { %v2590_v14 = vpop.permute.xlu1 %2589 }
 0x164   : > { %v2574_v28 = vpop.permute.xlu0 %2573  ;;  %v2917_v43 = vsel %vm2891_vm12, %v2884_v27, %v2590_v14 }
 0x165   : > { %v2901_v47 = vsel %vm2891_vm12, %v2868_v54, %v2574_v28  ;;  %v3883_v54 = vld [vmem:[%s3961_s19 + $0x48] sm:$0xf] }
 0x16a   : > { %v2592_v37 = vpop.permute.xlu1 %2591 }
 0x16b   : > { %v2919_v13 = vsel %vm2891_vm12, %v2886_v33, %v2592_v37 }
 0x16d   : > { %v2576_v63 = vpop.permute.xlu0 %2575 }
 0x16e   : > { %v2670_v31 = vpop.permute.xlu1 %2669  ;;  %v2903_v2 = vsel %vm2891_vm12, %v2870_v11, %v2576_v63 }
 0x16f   : > { %v2950_v8 = vsel %vm2924_vm13, %v2917_v43, %v2670_v31  ;;  %v3881_v43 = vld [vmem:[%s3961_s19 + $0xa8] sm:$0xf]  ;;  %v3882_v31 = vld [vmem:[%s3961_s19 + $0xac] sm:$0xf] }
 0x170   : > { %v2971_v21 = vsel %vm2957_vm14, %v2950_v8, 0  ;;  %v3555_v38 = vcombine.low %v3881_v43, %v3882_v31 }
 0x171   : > { %v2654_v16 = vpop.permute.xlu0 %2653  ;;  %3757 = vmatprep.mubr.msk.bf16.mxu1 %vm3002_vm15, %v2971_v21  ;;  %v3884_v21 = vld [vmem:[%s3961_s19 + $0x4c] sm:$0xf] }
 0x172   : > { %v2934_v17 = vsel %vm2924_vm13, %v2901_v47, %v2654_v16  ;;  %v3547_v47 = vcombine.low %v3883_v54, %v3884_v21 }
 0x173   : > { %v2963_v29 = vsel %vm2957_vm14, %v2934_v17, 0 }
 0x174   : > { %3741 = vmatprep.mubr.msk.bf16.mxu0 %vm3002_vm15, %v2963_v29 }
 0x177   : > { %v2114_v41 = vpop.permute.xlu1 %2113 }
 0x178   : > { %v2722_v34 = vsel %vm2677_vm6, %v3555_v38, %v2114_v41 }
 0x17b   : > { %v2098_v15 = vpop.permute.xlu0 %2097  ;;  %v2672_v24 = vpop.permute.xlu1 %2671 }
 0x17c   : > { %v2952_v6 = vsel %vm2924_vm13, %v2919_v13, %v2672_v24  ;;  %v2698_v44 = vsel %vm2677_vm6, %v3547_v47, %v2098_v15 }
 0x17d   : > { %v2972_v62 = vsel %vm2957_vm14, %v2952_v6, 0 }
 0x17e   : > { %3758 = vmatmul.mubr.msk.bf16.gmra.mrb[8].mxu1 %vm3002_vm15, %v2972_v62 }
 0x17f   : > { %v2656_v53 = vpop.permute.xlu0 %2655 }
 0x180   : > { %v2936_v22 = vsel %vm2924_vm13, %v2903_v2, %v2656_v53 }
 0x181   : > { %v2964_v58 = vsel %vm2957_vm14, %v2936_v22, 0 }
 0x182   : > { %3742 = vmatmul.mubr.msk.bf16.gmra.mrb[8].mxu0 %vm3002_vm15, %v2964_v58 }
 0x184   : > { %v2116_v51 = vpop.permute.xlu1 %2115 }
 0x185   : > { %v2725_v1 = vsel %vm2677_vm6, %v3556_v0, %v2116_v51 }
 0x187   : > { %v2100_v46 = vpop.permute.xlu0 %2099 }
 0x188   : > { %v2194_v45 = vpop.permute.xlu1 %2193  ;;  %v2701_v19 = vsel %vm2677_vm6, %v3548_v4, %v2100_v46 }
 0x189   : > { %v2756_v17 = vsel %vm2726_vm7, %v2722_v34, %v2194_v45 }
 0x18b   : > { %v2178_v35 = vpop.permute.xlu0 %2177 }
 0x18c   : > { %v2196_v14 = vpop.permute.xlu1 %2195  ;;  %v2740_v49 = vsel %vm2726_vm7, %v2698_v44, %v2178_v35 }
 0x18d   : > { %v2758_v3 = vsel %vm2726_vm7, %v2725_v1, %v2196_v14 }
 0x18f   : > { %v2180_v18 = vpop.permute.xlu0 %2179 }
 0x190   : > { %v2274_v26 = vpop.permute.xlu1 %2273  ;;  %v2742_v20 = vsel %vm2726_vm7, %v2701_v19, %v2180_v18 }
 0x191   : > { %v2789_v29 = vsel %vm2759_vm8, %v2756_v17, %v2274_v26 }
 0x193   : > { %v2258_v9 = vpop.permute.xlu0 %2257 }
 0x194   : > { %v2276_v12 = vpop.permute.xlu1 %2275  ;;  %v2773_v59 = vsel %vm2759_vm8, %v2740_v49, %v2258_v9 }
 0x195   : > { %v2791_v25 = vsel %vm2759_vm8, %v2758_v3, %v2276_v12 }
 0x197   : > { %v2260_v28 = vpop.permute.xlu0 %2259 }
 0x198   : > { %v2775_v39 = vsel %vm2759_vm8, %v2742_v20, %v2260_v28 }
 0x19a   : > { %v2354_v61 = vpop.permute.xlu1 %2353 }
 0x19b   : > { %v2338_v55 = vpop.permute.xlu0 %2337  ;;  %v2822_v23 = vsel %vm2792_vm9, %v2789_v29, %v2354_v61 }
 0x19c   : > { %v2806_v33 = vsel %vm2792_vm9, %v2773_v59, %v2338_v55 }
 0x19f   : > { %v2356_v5 = vpop.permute.xlu1 %2355 }
 0x1a0   : > { %v2824_v24 = vsel %vm2792_vm9, %v2791_v25, %v2356_v5 }
 0x1a3   : > { %v2434_v36 = vpop.permute.xlu1 %2433 }
 0x1a4   : > { %v2340_v37 = vpop.permute.xlu0 %2339  ;;  %v2855_v32 = vsel %vm2825_vm10, %v2822_v23, %v2434_v36 }
 0x1a5   : > { %v2808_v42 = vsel %vm2792_vm9, %v2775_v39, %v2340_v37 }
 0x1a8   : > { %v2418_v7 = vpop.permute.xlu0 %2417 }
 0x1a9   : > { %v2436_v48 = vpop.permute.xlu1 %2435  ;;  %v2839_v6 = vsel %vm2825_vm10, %v2806_v33, %v2418_v7 }
 0x1aa   : > { %v2857_v35 = vsel %vm2825_vm10, %v2824_v24, %v2436_v48 }
 0x1ac   : > { %v2420_v56 = vpop.permute.xlu0 %2419 }
 0x1ad   : > { %v2514_v30 = vpop.permute.xlu1 %2513  ;;  %v2841_v14 = vsel %vm2825_vm10, %v2808_v42, %v2420_v56 }
 0x1ae   : > { %v2888_v41 = vsel %vm2858_vm11, %v2855_v32, %v2514_v30 }
 0x1b0   : > { %v2498_v27 = vpop.permute.xlu0 %2497 }
 0x1b1   : > { %v2516_v63 = vpop.permute.xlu1 %2515  ;;  %v2872_v53 = vsel %vm2858_vm11, %v2839_v6, %v2498_v27 }
 0x1b2   : > { %v2890_v12 = vsel %vm2858_vm11, %v2857_v35, %v2516_v63 }
 0x1b4   : > { %v5847_v57 = vpop.permute.xlu0 %2499 }
 0x1b5   : > { %v2874_v30 = vsel %vm2858_vm11, %v2841_v14, %v5847_v57 }
 0x1b6   : > { %v2594_v8 = vpop.permute.xlu1 %2593 }
 0x1b7   : > { %v2921_v15 = vsel %vm2891_vm12, %v2888_v41, %v2594_v8 }
 0x1b9   : > { %v2578_v16 = vpop.permute.xlu0 %2577 }
 0x1ba   : > { %v2905_v18 = vsel %vm2891_vm12, %v2872_v53, %v2578_v16 }
 0x1bd   : > { %v2596_v40 = vpop.permute.xlu1 %2595 }
 0x1be   : > { %v2923_v37 = vsel %vm2891_vm12, %v2890_v12, %v2596_v40 }
 0x1c0   : > { %v2580_v10 = vpop.permute.xlu0 %2579 }
 0x1c1   : > { %v3735_v52 = vpop.f32.mrb[0].mxu0  ;;  %v2674_v50 = vpop.permute.xlu1 %2673  ;;  %v2907_v63 = vsel %vm2891_vm12, %v2874_v30, %v2580_v10 }
 0x1c2   : > { %v3751_v13 = vpop.f32.mrb[0].mxu1  ;;  %v2954_v11 = vsel %vm2924_vm13, %v2921_v15, %v2674_v50  ;;  %v3073_v62 = vpop.f32.mrb[1].mxu0  ;;  %v3082_v21 = vadd.f32 %v3735_v52, %v5873_v60 }
 0x1c3   : > { %v3137_v2 = vpop.f32.mrb[1].mxu1  ;;  %v2973_v22 = vsel %vm2957_vm14, %v2954_v11, 0  ;;  %v3074_v58 = vadd.f32 %v5873_v60, %v3073_v62  ;;  %v3736_v46 = vpop.f32.mrb[2].mxu0  ;;  %v3146_v8 = vadd.f32 %v3751_v13, %v5873_v60 }
 0x1c4   : > { %v3138_v51 = vadd.f32 %v5873_v60, %v3137_v2  ;;  %v3752_v45 = vpop.f32.mrb[2].mxu1  ;;  %v2658_v26 = vpop.permute.xlu0 %2657  ;;  %3761 = vmatprep.mubr.msk.bf16.mxu1 %vm3002_vm15, %v2973_v22  ;;  %v3202_v0 = vmax.f32 %v3082_v21, 0.0  ;;  %v3085_v4 = vadd.f32 %v3736_v46, %v5873_v60 }
 0x1c5   : > { %v3076_v9 = vpop.f32.mrb[3].mxu0  ;;  %v2938_v28 = vsel %vm2924_vm13, %v2905_v18, %v2658_v26  ;;  %v3200_v61 = vmax.f32 %v3074_v58, 0.0  ;;  %v3140_v5 = vpop.f32.mrb[3].mxu1  ;;  %v3218_v16 = vmax.f32 %v3146_v8, 0.0  ;;  %v3149_v34 = vadd.f32 %v3752_v45, %v5873_v60 }
 0x1c6   : > { %v3216_v55 = vmax.f32 %v3138_v51, 0.0  ;;  %v2965_v36 = vsel %vm2957_vm14, %v2938_v28, 0  ;;  %v2676_v7 = vpop.permute.xlu1 %2675  ;;  %v3077_v48 = vadd.f32 %v5873_v60, %v3076_v9  ;;  %v3141_v56 = vadd.f32 %v5873_v60, %v3140_v5 }
 0x1c7   : > { %3745 = vmatprep.mubr.msk.bf16.mxu0 %vm3002_vm15, %v2965_v36  ;;  %v2956_v27 = vsel %vm2924_vm13, %v2923_v37, %v2676_v7  ;;  %3232 = vxpose.xlu0.b32.start [1/16] (narrow) %v3200_v61, 8  ;;  %v3219_v17 = vmax.f32 %v3149_v34, 0.0  ;;  %v3203_v29 = vmax.f32 %v3085_v4, 0.0 }
 0x1c8   : > { %3264 = vxpose.xlu1.b32.start [1/16] (narrow) %v3216_v55, 8  ;;  %v2974_v43 = vsel %vm2957_vm14, %v2956_v27, 0  ;;  %v2660_v31 = vpop.permute.xlu0 %2659  ;;  %v3217_v54 = vmax.f32 %v3141_v56, 0.0  ;;  %v3201_v47 = vmax.f32 %v3077_v48, 0.0 }
 0x1c9   : > { %v2940_v38 = vsel %vm2924_vm13, %v2907_v63, %v2660_v31  ;;  %3762 = vmatmul.mubr.msk.bf16.gmra.mrb[12].mxu1 %vm3002_vm15, %v2974_v43 }
 0x1ca   : > { %v2966_v57 = vsel %vm2957_vm14, %v2940_v38, 0 }
 0x1cb   : > { %3746 = vmatmul.mubr.msk.bf16.gmra.mrb[12].mxu0 %vm3002_vm15, %v2966_v57  ;;  %3233 = vxpose.xlu0.b32.cont [2/16] (narrow) %v3201_v47, 8 }
 0x1cc   : > { %3265 = vxpose.xlu1.b32.cont [2/16] (narrow) %v3217_v54, 8 }
 0x1cf   : > { %3234 = vxpose.xlu0.b32.cont [3/16] (narrow) %v3202_v0, 8 }
 0x1d0   : > { %3266 = vxpose.xlu1.b32.cont [3/16] (narrow) %v3218_v16, 8 }
 0x1d3   : > { %3235 = vxpose.xlu0.b32.cont [4/16] (narrow) %v3203_v29, 8 }
 0x1d4   : > { %3267 = vxpose.xlu1.b32.cont [4/16] (narrow) %v3219_v17, 8 }
 0x212   : > { %v3755_v40 = vpop.f32.mrb[4].mxu1 }
 0x213   : > { %v3153_v44 = vpop.f32.mrb[5].mxu1  ;;  %v3162_v39 = vadd.f32 %v3755_v40, %v5873_v60 }
 0x214   : > { %v3739_v23 = vpop.f32.mrb[4].mxu0  ;;  %v3154_v1 = vadd.f32 %v5873_v60, %v3153_v44  ;;  %v3756_v19 = vpop.f32.mrb[6].mxu1 }
 0x215   : > { %v3089_v49 = vpop.f32.mrb[5].mxu0  ;;  %v3156_v32 = vpop.f32.mrb[7].mxu1  ;;  %v3098_v15 = vadd.f32 %v3739_v23, %v5873_v60  ;;  %v3222_v13 = vmax.f32 %v3162_v39, 0.0  ;;  %v3165_v24 = vadd.f32 %v3756_v19, %v5873_v60 }
 0x216   : > { %v3090_v3 = vadd.f32 %v5873_v60, %v3089_v49  ;;  %v3220_v20 = vmax.f32 %v3154_v1, 0.0  ;;  %v3740_v59 = vpop.f32.mrb[6].mxu0  ;;  %v3157_v41 = vadd.f32 %v5873_v60, %v3156_v32 }
 0x217   : > { %v3092_v10 = vpop.f32.mrb[7].mxu0  ;;  %v3206_v42 = vmax.f32 %v3098_v15, 0.0  ;;  %v3101_v6 = vadd.f32 %v3740_v59, %v5873_v60  ;;  %v3223_v11 = vmax.f32 %v3165_v24, 0.0 }
 0x218   : > { %v3204_v52 = vmax.f32 %v3090_v3, 0.0  ;;  %v3093_v25 = vadd.f32 %v5873_v60, %v3092_v10  ;;  %3268 = vxpose.xlu1.b32.cont [5/16] (narrow) %v3220_v20, 8  ;;  %v3221_v33 = vmax.f32 %v3157_v41, 0.0 }
 0x219   : > { %v3207_v62 = vmax.f32 %v3101_v6, 0.0 }
 0x21a   : > { %3236 = vxpose.xlu0.b32.cont [5/16] (narrow) %v3204_v52, 8  ;;  %v3205_v50 = vmax.f32 %v3093_v25, 0.0 }
 0x21c   : > { %3269 = vxpose.xlu1.b32.cont [6/16] (narrow) %v3221_v33, 8 }
 0x21e   : > { %3237 = vxpose.xlu0.b32.cont [6/16] (narrow) %v3205_v50, 8 }
 0x220   : > { %3270 = vxpose.xlu1.b32.cont [7/16] (narrow) %v3222_v13, 8 }
 0x222   : > { %3238 = vxpose.xlu0.b32.cont [7/16] (narrow) %v3206_v42, 8 }
 0x224   : > { %3271 = vxpose.xlu1.b32.cont [8/16] (narrow) %v3223_v11, 8 }
 0x226   : > { %3239 = vxpose.xlu0.b32.cont [8/16] (narrow) %v3207_v62, 8 }
 0x251   : > { %v3759_v2 = vpop.f32.mrb[8].mxu1 }
 0x252   : > { %v3169_v53 = vpop.f32.mrb[9].mxu1  ;;  %v3178_v61 = vadd.f32 %v3759_v2, %v5873_v60 }
 0x253   : > { %v3170_v22 = vadd.f32 %v5873_v60, %v3169_v53  ;;  %v3760_v58 = vpop.f32.mrb[10].mxu1 }
 0x254   : > { %v3172_v46 = vpop.f32.mrb[11].mxu1  ;;  %v3226_v36 = vmax.f32 %v3178_v61, 0.0  ;;  %v3181_v7 = vadd.f32 %v3760_v58, %v5873_v60 }
 0x255   : > { %v3743_v51 = vpop.f32.mrb[8].mxu0  ;;  %v3224_v35 = vmax.f32 %v3170_v22, 0.0  ;;  %v3173_v14 = vadd.f32 %v5873_v60, %v3172_v46 }
 0x256   : > { %v3105_v45 = vpop.f32.mrb[9].mxu0  ;;  %v3114_v5 = vadd.f32 %v3743_v51, %v5873_v60  ;;  %v3227_v30 = vmax.f32 %v3181_v7, 0.0 }
 0x257   : > { %v3106_v18 = vadd.f32 %v5873_v60, %v3105_v45  ;;  %v3744_v26 = vpop.f32.mrb[10].mxu0  ;;  %3272 = vxpose.xlu1.b32.cont [9/16] (narrow) %v3224_v35, 8  ;;  %v3225_v55 = vmax.f32 %v3173_v14, 0.0 }
 0x258   : > { %v3108_v9 = vpop.f32.mrb[11].mxu0  ;;  %v3210_v48 = vmax.f32 %v3114_v5, 0.0  ;;  %v3117_v56 = vadd.f32 %v3744_v26, %v5873_v60 }
 0x259   : > { %v3208_v12 = vmax.f32 %v3106_v18, 0.0  ;;  %v3109_v28 = vadd.f32 %v5873_v60, %v3108_v9 }
 0x25a   : > { %v3211_v27 = vmax.f32 %v3117_v56, 0.0 }
 0x25b   : > { %3240 = vxpose.xlu0.b32.cont [9/16] (narrow) %v3208_v12, 8  ;;  %3273 = vxpose.xlu1.b32.cont [10/16] (narrow) %v3225_v55, 8  ;;  %v3209_v37 = vmax.f32 %v3109_v28, 0.0 }
 0x25f   : > { %3241 = vxpose.xlu0.b32.cont [10/16] (narrow) %v3209_v37, 8  ;;  %3274 = vxpose.xlu1.b32.cont [11/16] (narrow) %v3226_v36, 8 }
 0x263   : > { %3242 = vxpose.xlu0.b32.cont [11/16] (narrow) %v3210_v48, 8  ;;  %3275 = vxpose.xlu1.b32.cont [12/16] (narrow) %v3227_v30, 8 }
 0x267   : > { %3243 = vxpose.xlu0.b32.cont [12/16] (narrow) %v3211_v27, 8 }
 0x29c   : > { %v3763_v63 = vpop.f32.mrb[12].mxu1 }
 0x29d   : > { %v3185_v43 = vpop.f32.mrb[13].mxu1  ;;  %v3194_v29 = vadd.f32 %v3763_v63, %v5873_v60 }
 0x29e   : > { %v3747_v31 = vpop.f32.mrb[12].mxu0  ;;  %v3186_v38 = vadd.f32 %v5873_v60, %v3185_v43  ;;  %v3764_v8 = vpop.f32.mrb[14].mxu1 }
 0x29f   : > { %v3121_v54 = vpop.f32.mrb[13].mxu0  ;;  %v3188_v57 = vpop.f32.mrb[15].mxu1  ;;  %v3130_v44 = vadd.f32 %v3747_v31, %v5873_v60  ;;  %v3230_v1 = vmax.f32 %v3194_v29, 0.0  ;;  %v3197_v19 = vadd.f32 %v3764_v8, %v5873_v60 }
 0x2a0   : > { %v3122_v21 = vadd.f32 %v5873_v60, %v3121_v54  ;;  %v3228_v47 = vmax.f32 %v3186_v38, 0.0  ;;  %v3748_v16 = vpop.f32.mrb[14].mxu0  ;;  %v3189_v34 = vadd.f32 %v5873_v60, %v3188_v57 }
 0x2a1   : > { %v3124_v0 = vpop.f32.mrb[15].mxu0  ;;  %v3214_v49 = vmax.f32 %v3130_v44, 0.0  ;;  %v3133_v32 = vadd.f32 %v3748_v16, %v5873_v60  ;;  %v3231_v3 = vmax.f32 %v3197_v19, 0.0 }
 0x2a2   : > { %v3212_v4 = vmax.f32 %v3122_v21, 0.0  ;;  %v3125_v17 = vadd.f32 %v5873_v60, %v3124_v0  ;;  %3276 = vxpose.xlu1.b32.cont [13/16] (narrow) %v3228_v47, 8  ;;  %v3229_v40 = vmax.f32 %v3189_v34, 0.0 }
 0x2a3   : > { %v3215_v20 = vmax.f32 %v3133_v32, 0.0 }
 0x2a4   : > { %3244 = vxpose.xlu0.b32.cont [13/16] (narrow) %v3212_v4, 8  ;;  %v3213_v23 = vmax.f32 %v3125_v17, 0.0 }
 0x2a6   : > { %3277 = vxpose.xlu1.b32.cont [14/16] (narrow) %v3229_v40, 8 }
 0x2a8   : > { %3245 = vxpose.xlu0.b32.cont [14/16] (narrow) %v3213_v23, 8 }
 0x2aa   : > { %3278 = vxpose.xlu1.b32.cont [15/16] (narrow) %v3230_v1, 8 }
 0x2ac   : > { %3246 = vxpose.xlu0.b32.cont [15/16] (narrow) %v3214_v49, 8 }
 0x2ae   : > { %3279 = vxpose.xlu1.b32.end [16/16] (narrow) %v3231_v3, 8 }
 0x2b0   : > { %3247 = vxpose.xlu0.b32.end [16/16] (narrow) %v3215_v20, 8 }
 0x2f2   : > { %v3280_v59 = vpop.trf.xlu1 }
 0x2f3   : > { %3297 = vst [vmem:[%s192_s16 + $0x8] sm:$0xff] %v3280_v59 }
 0x2f4   : > { %v3248_v41 = vpop.trf.xlu0 }
 0x2f5   : > { %3296 = vst [vmem:[%s192_s16] sm:$0xff] %v3248_v41 }
 0x2f6 PF: > { %s13_s14 = sadd.s32 1, %s3907_s14   ;;  %s5956_s12 = smov %s3903_s13 }
 0x2f7   : > { %p10_p5 = scmp.ge.s32.totalorder %s13_s14, 4   ;;  %s5957_s13 = smov %s5959_s15 }
 0x2f9   :  { %12 = sbr.rel (!%p10_p5) target bundleno = 2 (0x2), region = 65 }

</bundles_post_ra>
